<compile_context>
chip_gen: v6e
topology: v6e:2x2x1
jax: 0.10.0
libtpu: 0.0.40
codegen_flags: <defaults>
</compile_context>

<pallas_src>
import math
from functools import partial

import numpy as np
import jax
import jax.numpy as jnp
from jax.experimental import pallas as pl
from jax.experimental.pallas import tpu as pltpu

# ---------------- small ChatGLM2-style config ----------------
SEQ = 8
BATCH = 2
HIDDEN = 32
NUM_HEADS = 4
HEAD_DIM = 8                        # kv_channels
MQ_GROUPS = 2                       # multi_query_group_num
FFN = 64                            # ffn_hidden_size
EPS = 1e-5
ROT_DIM = HEAD_DIM // 2             # ChatGLM2 rotary dim = kv_channels // 2
Q_SZ = NUM_HEADS * HEAD_DIM
KV_SZ = MQ_GROUPS * HEAD_DIM
QKV_HIDDEN = Q_SZ + 2 * KV_SZ


# ---------------- fused GLMBlock Pallas kernel ----------------
def _rope_rotate(x, cos_t, sin_even, sin_odd):
    """Interleaved-pair RoPE on the VPU.

    out = x * cos + shift_left(x) * sin_even + shift_right(x) * sin_odd,
    where sin_even = -sin on even rotary lanes (0 elsewhere) and
          sin_odd  = +sin on odd rotary lanes (0 elsewhere).
    Pure element-wise math + static lane shifts (slices + concat); no partner
    matmul and no direction-ambiguous roll primitive.
    """
    rows = x.shape[0]
    zero_col = jnp.zeros((rows, 1), x.dtype)
    shl = jnp.concatenate([x[:, 1:], zero_col], axis=-1)    # shl[i] = x[i+1]
    shr = jnp.concatenate([zero_col, x[:, :-1]], axis=-1)   # shr[i] = x[i-1]
    return x * cos_t + shl * sin_even + shr * sin_odd


def _glm_block_kernel(
    x_ref, lnw_ref, rope_ref,
    wq_ref, wk_ref, wv_ref, wdense_ref, wgate_ref, wup_ref, w2_ref,
    out_ref, kv_ref, ctx_scr,
    *, seq, batch, num_heads, mq_groups, head_dim, eps, scale):
    s, b, d = seq, batch, head_dim
    rows = s * b
    rep = num_heads // mq_groups
    q_sz = num_heads * d
    kv_sz = mq_groups * d
    hidden = x_ref.shape[-1]

    # ---- tokens already folded to [s*b, hidden] (seq-major, batch-minor) ----
    x = x_ref[...].astype(jnp.float32)

    # ---- input RMSNorm (f32) ----
    var1 = jnp.mean(x * x, axis=-1, keepdims=True)
    ln1 = lnw_ref[0:1, :].astype(jnp.float32) * (x * jax.lax.rsqrt(var1 + eps))

    # ---- QKV projection; bias folded in via an appended ones column.
    #      bf16 MXU operands, f32 accumulation. ----
    ln1_aug = jnp.concatenate(
        [ln1, jnp.ones((rows, 1), jnp.float32)], axis=-1).astype(jnp.bfloat16)
    q = jnp.dot(ln1_aug, wq_ref[...], preferred_element_type=jnp.float32)
    k = jnp.dot(ln1_aug, wk_ref[...], preferred_element_type=jnp.float32)
    v = jnp.dot(ln1_aug, wv_ref[...], preferred_element_type=jnp.float32)

    # ---- RoPE (VPU only; k tables are a prefix of the q tables) ----
    cos_t = rope_ref[0]
    sin_e = rope_ref[1]
    sin_o = rope_ref[2]
    q = _rope_rotate(q, cos_t, sin_e, sin_o)
    k = _rope_rotate(k, cos_t[:, :kv_sz], sin_e[:, :kv_sz], sin_o[:, :kv_sz])

    # ---- merged kv-cache output (single lane-dense store) ----
    kv_ref[...] = jnp.concatenate([k, v], axis=-1).astype(kv_ref.dtype)

    # ---- causal multi-query attention: one score/PV matmul pair per
    #      (batch, mqa-group); the rep query heads are stacked along rows ----
    q3 = q.reshape(s, b, q_sz)
    k3 = k.reshape(s, b, kv_sz)
    v3 = v.reshape(s, b, kv_sz)
    row = jax.lax.broadcasted_iota(jnp.int32, (s, s), 0)
    col = jax.lax.broadcasted_iota(jnp.int32, (s, s), 1)
    neg = jnp.where(col <= row, 0.0, -1e30).astype(jnp.float32)   # additive causal mask
    neg_rep = jnp.concatenate([neg] * rep, axis=0)                # tiled over stacked heads

    for bi in range(b):
        for g in range(mq_groups):
            q_stack = jnp.concatenate(
                [q3[:, bi, (g * rep + r) * d:(g * rep + r + 1) * d] for r in range(rep)],
                axis=0)                                           # [rep*s, d]
            kh = k3[:, bi, g * d:(g + 1) * d]                     # shared group K (no dup)
            vh = v3[:, bi, g * d:(g + 1) * d]
            sc = jax.lax.dot_general(
                q_stack.astype(jnp.bfloat16), kh.astype(jnp.bfloat16),
                (((1,), (1,)), ((), ())),
                preferred_element_type=jnp.float32) * scale + neg_rep
            m = jnp.max(sc, axis=-1, keepdims=True)
            p = jnp.exp(sc - m)
            p = p / jnp.sum(p, axis=-1, keepdims=True)            # exact normalization
            ctx = jnp.dot(p.astype(jnp.bfloat16), vh.astype(jnp.bfloat16),
                          preferred_element_type=jnp.float32)     # [rep*s, d]
            for r in range(rep):
                ctx_scr[:, bi, (g * rep + r) * d:(g * rep + r + 1) * d] = \
                    ctx[r * s:(r + 1) * s, :]

    # ---- single long-K dense projection from the ctx scratch ----
    ctx2 = ctx_scr[...].reshape(rows, q_sz).astype(jnp.bfloat16)
    attn_out = jnp.dot(ctx2, wdense_ref[...], preferred_element_type=jnp.float32)

    # ---- residual + post-attention RMSNorm ----
    ln_in = x + attn_out
    var2 = jnp.mean(ln_in * ln_in, axis=-1, keepdims=True)
    ln2 = lnw_ref[1:2, :].astype(jnp.float32) * (ln_in * jax.lax.rsqrt(var2 + eps))

    # ---- SwiGLU MLP ----
    ln2_b = ln2.astype(jnp.bfloat16)
    gate = jnp.dot(ln2_b, wgate_ref[...], preferred_element_type=jnp.float32)
    up = jnp.dot(ln2_b, wup_ref[...], preferred_element_type=jnp.float32)
    act = (gate * jax.nn.sigmoid(gate)) * up
    mlp_out = jnp.dot(act.astype(jnp.bfloat16), w2_ref[...],
                      preferred_element_type=jnp.float32)

    out_ref[...] = (ln_in + mlp_out).astype(out_ref.dtype)


def _rope_tables(rope_cache, seq, batch):
    """Lane-dense per-row RoPE tables: [3, seq*batch, Q_SZ] = (cos, -sin@even, +sin@odd)."""
    cos2 = rope_cache[:seq, 0, :, 0]                     # [seq, ROT_DIM//2]
    sin2 = rope_cache[:seq, 0, :, 1]
    zeros2 = jnp.zeros_like(sin2)
    pad = jnp.zeros((seq, HEAD_DIM - ROT_DIM), jnp.float32)
    ones_pad = jnp.ones((seq, HEAD_DIM - ROT_DIM), jnp.float32)
    cos_hd = jnp.concatenate([jnp.repeat(cos2, 2, axis=1), ones_pad], axis=1)
    sin_e_hd = jnp.concatenate(
        [jnp.stack([-sin2, zeros2], axis=-1).reshape(seq, ROT_DIM), pad], axis=1)
    sin_o_hd = jnp.concatenate(
        [jnp.stack([zeros2, sin2], axis=-1).reshape(seq, ROT_DIM), pad], axis=1)

    def per_rows(t):   # tile per head over lanes, repeat rows for the (seq, batch) fold
        return jnp.repeat(jnp.tile(t, (1, NUM_HEADS)), batch, axis=0)

    return jnp.stack([per_rows(cos_hd), per_rows(sin_e_hd), per_rows(sin_o_hd)], axis=0)


def glm_block_forward(params, hidden_states, rope_cache):
    s, b, h = hidden_states.shape
    dt = hidden_states.dtype

    # one-time parameter prep: split qkv / swiglu weights, fold the qkv bias
    # into an extra weight row, cast every MXU weight operand to bf16, merge
    # the two RMSNorm weights into one small input.
    wqkv_b = jnp.concatenate(
        [params["wqkv"], params["bqkv"].reshape(1, QKV_HIDDEN)], axis=0)   # [h+1, QKV]
    wq = wqkv_b[:, :Q_SZ].astype(jnp.bfloat16)
    wk = wqkv_b[:, Q_SZ:Q_SZ + KV_SZ].astype(jnp.bfloat16)
    wv = wqkv_b[:, Q_SZ + KV_SZ:].astype(jnp.bfloat16)
    wgate = params["w1"][:, :FFN].astype(jnp.bfloat16)
    wup = params["w1"][:, FFN:].astype(jnp.bfloat16)
    wdense = params["wdense"].astype(jnp.bfloat16)
    w2 = params["w2"].astype(jnp.bfloat16)
    ln_w = jnp.stack([params["ln1_w"], params["ln2_w"]], axis=0)           # [2, h]
    rope_tabs = _rope_tables(rope_cache, s, b).astype(jnp.float32)

    # free contiguous reshape (no HBM transpose): [s,b,h] -> [s*b, h]
    x2 = hidden_states.reshape(s * b, h)

    out2, kv2 = pl.pallas_call(
        partial(_glm_block_kernel, seq=s, batch=b, num_heads=NUM_HEADS,
                mq_groups=MQ_GROUPS, head_dim=HEAD_DIM, eps=EPS,
                scale=1.0 / math.sqrt(HEAD_DIM)),
        out_shape=(jax.ShapeDtypeStruct((s * b, h), dt),
                   jax.ShapeDtypeStruct((s * b, 2 * KV_SZ), dt)),
        scratch_shapes=[pltpu.VMEM((s, b, Q_SZ), jnp.float32)],
    )(x2, ln_w, rope_tabs, wq, wk, wv, wdense, wgate, wup, w2)

    out = out2.reshape(s, b, h)
    kv3 = kv2.reshape(s, b, 2 * KV_SZ)
    k_cache = kv3[..., :KV_SZ].reshape(s, b, MQ_GROUPS, HEAD_DIM)
    v_cache = kv3[..., KV_SZ:].reshape(s, b, MQ_GROUPS, HEAD_DIM)
    return out, (k_cache, v_cache)


# ---------------- params ----------------
def init_params(key):
    ks = jax.random.split(key, 7)
    s = 0.02
    return dict(
        ln1_w=jnp.ones((HIDDEN,), jnp.float32) + 0.01 * jax.random.normal(ks[0], (HIDDEN,)),
        ln2_w=jnp.ones((HIDDEN,), jnp.float32) + 0.01 * jax.random.normal(ks[1], (HIDDEN,)),
        wqkv=s * jax.random.normal(ks[2], (HIDDEN, QKV_HIDDEN), jnp.float32),
        bqkv=s * jax.random.normal(ks[3], (QKV_HIDDEN,), jnp.float32),
        wdense=s * jax.random.normal(ks[4], (NUM_HEADS * HEAD_DIM, HIDDEN), jnp.float32),
        w1=s * jax.random.normal(ks[5], (HIDDEN, 2 * FFN), jnp.float32),
        w2=s * jax.random.normal(ks[6], (FFN, HIDDEN), jnp.float32),
    )


# ---------------- pure-JAX f32 reference (correctness check) ----------------
def apply_rotary_pos_emb_ref(x, rope_cache):
    sq, b, nh, hn = x.shape
    rot_dim = rope_cache.shape[-2] * 2
    x_rot, x_pass = x[..., :rot_dim], x[..., rot_dim:]
    rope = rope_cache[:sq].reshape(sq, -1, 1, rot_dim // 2, 2)
    xshaped = x_rot.reshape(sq, -1, nh, rot_dim // 2, 2)
    out = jnp.stack(
        [xshaped[..., 0] * rope[..., 0] - xshaped[..., 1] * rope[..., 1],
         xshaped[..., 1] * rope[..., 0] + xshaped[..., 0] * rope[..., 1]],
        axis=-1,
    ).reshape(sq, -1, nh, rot_dim)
    return jnp.concatenate([out, x_pass], axis=-1)


def glm_block_reference(params, hidden_states, rope_cache):
    def rmsnorm(x, w):
        xf = x.astype(jnp.float32)
        var = jnp.mean(xf * xf, axis=-1, keepdims=True)
        return (w * (xf * jax.lax.rsqrt(var + EPS))).astype(x.dtype)

    s, b, h = hidden_states.shape
    x2d = hidden_states.reshape(s * b, h)
    ln1 = rmsnorm(x2d, params["ln1_w"])
    qkv = (ln1 @ params["wqkv"] + params["bqkv"]).reshape(s, b, QKV_HIDDEN)
    q = qkv[..., :Q_SZ].reshape(s, b, NUM_HEADS, HEAD_DIM)
    k = qkv[..., Q_SZ:Q_SZ + KV_SZ].reshape(s, b, MQ_GROUPS, HEAD_DIM)
    v = qkv[..., Q_SZ + KV_SZ:].reshape(s, b, MQ_GROUPS, HEAD_DIM)
    q = apply_rotary_pos_emb_ref(q, rope_cache)
    k = apply_rotary_pos_emb_ref(k, rope_cache)
    rep = NUM_HEADS // MQ_GROUPS
    k_full = jnp.broadcast_to(k[:, :, :, None, :],
                              (s, b, MQ_GROUPS, rep, HEAD_DIM)).reshape(s, b, NUM_HEADS, HEAD_DIM)
    v_full = jnp.broadcast_to(v[:, :, :, None, :],
                              (s, b, MQ_GROUPS, rep, HEAD_DIM)).reshape(s, b, NUM_HEADS, HEAD_DIM)
    qb = q.transpose(1, 2, 0, 3)
    kb = k_full.transpose(1, 2, 0, 3)
    vb = v_full.transpose(1, 2, 0, 3)
    scores = jnp.einsum("bhqd,bhkd->bhqk", qb, kb) / math.sqrt(HEAD_DIM)
    causal = jnp.tril(jnp.ones((s, s), bool))
    scores = jnp.where(causal[None, None], scores, -jnp.inf)
    probs = jax.nn.softmax(scores, axis=-1)
    ctx = jnp.einsum("bhqk,bhkd->bhqd", probs, vb)
    ctx = ctx.transpose(2, 0, 1, 3).reshape(s * b, NUM_HEADS * HEAD_DIM)
    attn_out = ctx @ params["wdense"]
    ln_in = x2d + attn_out
    ln2 = rmsnorm(ln_in, params["ln2_w"])
    h4 = ln2 @ params["w1"]
    a, g = h4[:, :FFN], h4[:, FFN:]
    mlp_out = ((a * jax.nn.sigmoid(a)) * g) @ params["w2"]
    out = ln_in + mlp_out
    return out.reshape(s, b, h), (k, v)


if __name__ == "__main__":
    key = jax.random.PRNGKey(0)
    kp, kx = jax.random.split(key)
    params = init_params(kp)
    hidden_states = jax.random.normal(kx, (SEQ, BATCH, HIDDEN), jnp.float32)

    # ChatGLM2-style rope cache: [seq, 1, rot_dim//2, 2] = (cos, sin)
    half = ROT_DIM // 2
    theta = 1.0 / (10000.0 ** (jnp.arange(half, dtype=jnp.float32) * 2.0 / ROT_DIM))
    idx_theta = jnp.outer(jnp.arange(SEQ, dtype=jnp.float32), theta)
    rope_cache = jnp.stack([jnp.cos(idx_theta), jnp.sin(idx_theta)], axis=-1).reshape(
        SEQ, 1, half, 2)

    fwd = jax.jit(glm_block_forward)
    out, (kc, vc) = fwd(params, hidden_states, rope_cache)
    out = jax.block_until_ready(out)

    ref_out, (ref_k, ref_v) = glm_block_reference(params, hidden_states, rope_cache)
    assert out.shape == (SEQ, BATCH, HIDDEN)
    assert kc.shape == (SEQ, BATCH, MQ_GROUPS, HEAD_DIM)
    assert vc.shape == (SEQ, BATCH, MQ_GROUPS, HEAD_DIM)
    # tolerance loosened vs the pure-f32 reference because all MXU operands
    # (weights + activations) are bf16 in the kernel (f32 accumulation).
    np.testing.assert_allclose(np.asarray(out), np.asarray(ref_out), rtol=2e-2, atol=2e-2)
    np.testing.assert_allclose(np.asarray(kc), np.asarray(ref_k), rtol=2e-2, atol=2e-2)
    np.testing.assert_allclose(np.asarray(vc), np.asarray(ref_v), rtol=2e-2, atol=2e-2)
    print("KERNEL_OK")
</pallas_src>

<mosaic_0001>
module attributes {stable_mosaic.version = 11 : i64} {
  func.func @_glm_block_kernel(%arg0: memref<16x32xf32, #tpu.memory_space<vmem>>, %arg1: memref<2x32xf32, #tpu.memory_space<vmem>>, %arg2: memref<3x16x32xf32, #tpu.memory_space<vmem>>, %arg3: memref<33x32xbf16, #tpu.memory_space<vmem>>, %arg4: memref<33x16xbf16, #tpu.memory_space<vmem>>, %arg5: memref<33x16xbf16, #tpu.memory_space<vmem>>, %arg6: memref<32x32xbf16, #tpu.memory_space<vmem>>, %arg7: memref<32x64xbf16, #tpu.memory_space<vmem>>, %arg8: memref<32x64xbf16, #tpu.memory_space<vmem>>, %arg9: memref<64x32xbf16, #tpu.memory_space<vmem>>, %arg10: memref<16x32xf32, #tpu.memory_space<vmem>>, %arg11: memref<16x32xf32, #tpu.memory_space<vmem>>, %arg12: memref<8x2x32xf32, #tpu.memory_space<vmem>>) attributes {dimension_semantics = [], scalar_prefetch = 0 : i64, scratch_operands = 1 : i64, tpu.core_type = #tpu.core_type<tc>} {
    %c0 = arith.constant 0 : index
    %c0_0 = arith.constant 0 : index
    %0 = vector.load %arg0[%c0, %c0_0] : memref<16x32xf32, #tpu.memory_space<vmem>>, vector<16x32xf32>
    %1 = arith.mulf %0, %0 : vector<16x32xf32>
    %cst = arith.constant dense<0.000000e+00> : vector<16xf32>
    %2 = vector.multi_reduction <add>, %1, %cst [1] : vector<16x32xf32> to vector<16xf32>
    %3 = vector.shape_cast %2 : vector<16xf32> to vector<16x1xf32>
    %cst_1 = arith.constant 3.200000e+01 : f32
    %4 = vector.broadcast %cst_1 : f32 to vector<16x1xf32>
    %5 = arith.divf %3, %4 : vector<16x1xf32>
    %c0_2 = arith.constant 0 : index
    %c0_3 = arith.constant 0 : index
    %6 = vector.load %arg1[%c0_2, %c0_3] : memref<2x32xf32, #tpu.memory_space<vmem>>, vector<1x32xf32>
    %cst_4 = arith.constant 9.99999974E-6 : f32
    %7 = vector.broadcast %cst_4 : f32 to vector<16x1xf32>
    %8 = arith.addf %5, %7 : vector<16x1xf32>
    %9 = math.rsqrt %8 : vector<16x1xf32>
    %10 = vector.broadcast %9 : vector<16x1xf32> to vector<16x32xf32>
    %11 = arith.mulf %0, %10 : vector<16x32xf32>
    %12 = vector.broadcast %6 : vector<1x32xf32> to vector<16x32xf32>
    %13 = arith.mulf %12, %11 : vector<16x32xf32>
    %cst_5 = arith.constant 1.000000e+00 : f32
    %14 = vector.broadcast %cst_5 : f32 to vector<16x1xf32>
    %15 = tpu.concatenate %13, %14 in 1 : vector<16x32xf32>, vector<16x1xf32> -> vector<16x33xf32>
    %16 = arith.truncf %15 : vector<16x33xf32> to vector<16x33xbf16>
    %c0_6 = arith.constant 0 : index
    %c0_7 = arith.constant 0 : index
    %17 = vector.load %arg3[%c0_6, %c0_7] : memref<33x32xbf16, #tpu.memory_space<vmem>>, vector<33x32xbf16>
    %cst_8 = arith.constant dense<0.000000e+00> : vector<16x32xf32>
    %18 = tpu.matmul %16, %17, %cst_8 {dimension_numbers = #tpu.dot_dimension_numbers<[1], [0], [0], [1], [0, 0, 1, 1], [], []>} : vector<16x33xbf16>, vector<33x32xbf16>, vector<16x32xf32> -> vector<16x32xf32>
    %c0_9 = arith.constant 0 : index
    %c0_10 = arith.constant 0 : index
    %19 = vector.load %arg4[%c0_9, %c0_10] : memref<33x16xbf16, #tpu.memory_space<vmem>>, vector<33x16xbf16>
    %cst_11 = arith.constant dense<0.000000e+00> : vector<16x16xf32>
    %20 = tpu.matmul %16, %19, %cst_11 {dimension_numbers = #tpu.dot_dimension_numbers<[1], [0], [0], [1], [0, 0, 1, 1], [], []>} : vector<16x33xbf16>, vector<33x16xbf16>, vector<16x16xf32> -> vector<16x16xf32>
    %c0_12 = arith.constant 0 : index
    %c0_13 = arith.constant 0 : index
    %21 = vector.load %arg5[%c0_12, %c0_13] : memref<33x16xbf16, #tpu.memory_space<vmem>>, vector<33x16xbf16>
    %cst_14 = arith.constant dense<0.000000e+00> : vector<16x16xf32>
    %22 = tpu.matmul %16, %21, %cst_14 {dimension_numbers = #tpu.dot_dimension_numbers<[1], [0], [0], [1], [0, 0, 1, 1], [], []>} : vector<16x33xbf16>, vector<33x16xbf16>, vector<16x16xf32> -> vector<16x16xf32>
    %c0_15 = arith.constant 0 : index
    %c0_16 = arith.constant 0 : index
    %c0_17 = arith.constant 0 : index
    %23 = vector.load %arg2[%c0_15, %c0_16, %c0_17] : memref<3x16x32xf32, #tpu.memory_space<vmem>>, vector<1x16x32xf32>
    %24 = vector.shape_cast %23 : vector<1x16x32xf32> to vector<16x32xf32>
    %c1 = arith.constant 1 : index
    %c0_18 = arith.constant 0 : index
    %c0_19 = arith.constant 0 : index
    %25 = vector.load %arg2[%c1, %c0_18, %c0_19] : memref<3x16x32xf32, #tpu.memory_space<vmem>>, vector<1x16x32xf32>
    %26 = vector.shape_cast %25 : vector<1x16x32xf32> to vector<16x32xf32>
    %c2 = arith.constant 2 : index
    %c0_20 = arith.constant 0 : index
    %c0_21 = arith.constant 0 : index
    %27 = vector.load %arg2[%c2, %c0_20, %c0_21] : memref<3x16x32xf32, #tpu.memory_space<vmem>>, vector<1x16x32xf32>
    %28 = vector.shape_cast %27 : vector<1x16x32xf32> to vector<16x32xf32>
    %cst_22 = arith.constant 0.000000e+00 : f32
    %29 = vector.broadcast %cst_22 : f32 to vector<16x1xf32>
    %30 = vector.extract_strided_slice %18 {offsets = [0, 1], sizes = [16, 31], strides = [1, 1]} : vector<16x32xf32> to vector<16x31xf32>
    %31 = tpu.concatenate %30, %29 in 1 : vector<16x31xf32>, vector<16x1xf32> -> vector<16x32xf32>
    %32 = vector.extract_strided_slice %18 {offsets = [0, 0], sizes = [16, 31], strides = [1, 1]} : vector<16x32xf32> to vector<16x31xf32>
    %33 = tpu.concatenate %29, %32 in 1 : vector<16x1xf32>, vector<16x31xf32> -> vector<16x32xf32>
    %34 = arith.mulf %18, %24 : vector<16x32xf32>
    %35 = arith.mulf %31, %26 : vector<16x32xf32>
    %36 = arith.addf %34, %35 : vector<16x32xf32>
    %37 = arith.mulf %33, %28 : vector<16x32xf32>
    %38 = arith.addf %36, %37 : vector<16x32xf32>
    %39 = vector.extract_strided_slice %24 {offsets = [0, 0], sizes = [16, 16], strides = [1, 1]} : vector<16x32xf32> to vector<16x16xf32>
    %40 = vector.extract_strided_slice %26 {offsets = [0, 0], sizes = [16, 16], strides = [1, 1]} : vector<16x32xf32> to vector<16x16xf32>
    %41 = vector.extract_strided_slice %28 {offsets = [0, 0], sizes = [16, 16], strides = [1, 1]} : vector<16x32xf32> to vector<16x16xf32>
    %cst_23 = arith.constant 0.000000e+00 : f32
    %42 = vector.broadcast %cst_23 : f32 to vector<16x1xf32>
    %43 = vector.extract_strided_slice %20 {offsets = [0, 1], sizes = [16, 15], strides = [1, 1]} : vector<16x16xf32> to vector<16x15xf32>
    %44 = tpu.concatenate %43, %42 in 1 : vector<16x15xf32>, vector<16x1xf32> -> vector<16x16xf32>
    %45 = vector.extract_strided_slice %20 {offsets = [0, 0], sizes = [16, 15], strides = [1, 1]} : vector<16x16xf32> to vector<16x15xf32>
    %46 = tpu.concatenate %42, %45 in 1 : vector<16x1xf32>, vector<16x15xf32> -> vector<16x16xf32>
    %47 = arith.mulf %20, %39 : vector<16x16xf32>
    %48 = arith.mulf %44, %40 : vector<16x16xf32>
    %49 = arith.addf %47, %48 : vector<16x16xf32>
    %50 = arith.mulf %46, %41 : vector<16x16xf32>
    %51 = arith.addf %49, %50 : vector<16x16xf32>
    %52 = tpu.concatenate %51, %22 in 1 : vector<16x16xf32>, vector<16x16xf32> -> vector<16x32xf32>
    %c0_24 = arith.constant 0 : index
    %c0_25 = arith.constant 0 : index
    %53 = vector.load %arg11[%c0_24, %c0_25] : memref<16x32xf32, #tpu.memory_space<vmem>>, vector<16x32xf32>
    tpu.vector_store %arg11[%c0_24, %c0_25], %52 {strides = array<i32>} : memref<16x32xf32, #tpu.memory_space<vmem>>, vector<16x32xf32>,
    %54 = vector.shape_cast %38 : vector<16x32xf32> to vector<8x2x32xf32>
    %55 = vector.shape_cast %51 : vector<16x16xf32> to vector<8x2x16xf32>
    %56 = vector.shape_cast %22 : vector<16x16xf32> to vector<8x2x16xf32>
    %57 = tpu.iota {dimensions = array<i32: 0>} : vector<8x8xi32>
    %58 = tpu.iota {dimensions = array<i32: 1>} : vector<8x8xi32>
    %59 = arith.cmpi sle, %58, %57 : vector<8x8xi32>
    %cst_26 = arith.constant 0.000000e+00 : f32
    %cst_27 = arith.constant -1.000000e+30 : f32
    %60 = vector.broadcast %cst_26 : f32 to vector<8x8xf32>
    %61 = vector.broadcast %cst_27 : f32 to vector<8x8xf32>
    %62 = arith.select %59, %60, %61 : vector<8x8xi1>, vector<8x8xf32>
    %63 = tpu.concatenate %62, %62 in 0 : vector<8x8xf32>, vector<8x8xf32> -> vector<16x8xf32>
    %64 = vector.extract_strided_slice %54 {offsets = [0, 0, 0], sizes = [8, 1, 8], strides = [1, 1, 1]} : vector<8x2x32xf32> to vector<8x1x8xf32>
    %65 = vector.shape_cast %64 : vector<8x1x8xf32> to vector<8x8xf32>
    %66 = vector.extract_strided_slice %54 {offsets = [0, 0, 8], sizes = [8, 1, 8], strides = [1, 1, 1]} : vector<8x2x32xf32> to vector<8x1x8xf32>
    %67 = vector.shape_cast %66 : vector<8x1x8xf32> to vector<8x8xf32>
    %68 = tpu.concatenate %65, %67 in 0 : vector<8x8xf32>, vector<8x8xf32> -> vector<16x8xf32>
    %69 = vector.extract_strided_slice %55 {offsets = [0, 0, 0], sizes = [8, 1, 8], strides = [1, 1, 1]} : vector<8x2x16xf32> to vector<8x1x8xf32>
    %70 = vector.shape_cast %69 : vector<8x1x8xf32> to vector<8x8xf32>
    %71 = vector.extract_strided_slice %56 {offsets = [0, 0, 0], sizes = [8, 1, 8], strides = [1, 1, 1]} : vector<8x2x16xf32> to vector<8x1x8xf32>
    %72 = vector.shape_cast %71 : vector<8x1x8xf32> to vector<8x8xf32>
    %73 = arith.truncf %68 : vector<16x8xf32> to vector<16x8xbf16>
    %74 = arith.truncf %70 : vector<8x8xf32> to vector<8x8xbf16>
    %cst_28 = arith.constant dense<0.000000e+00> : vector<16x8xf32>
    %75 = tpu.matmul %73, %74, %cst_28 {dimension_numbers = #tpu.dot_dimension_numbers<[1], [1], [0], [0], [0, 0, 1, 0], [], []>} : vector<16x8xbf16>, vector<8x8xbf16>, vector<16x8xf32> -> vector<16x8xf32>
    %cst_29 = arith.constant 0.353553385 : f32
    %76 = vector.broadcast %cst_29 : f32 to vector<16x8xf32>
    %77 = arith.mulf %75, %76 : vector<16x8xf32>
    %78 = arith.addf %77, %63 : vector<16x8xf32>
    %cst_30 = arith.constant dense<0xFF800000> : vector<16xf32>
    %79 = vector.multi_reduction <maximumf>, %78, %cst_30 [1] : vector<16x8xf32> to vector<16xf32>
    %80 = vector.shape_cast %79 : vector<16xf32> to vector<16x1xf32>
    %81 = vector.broadcast %80 : vector<16x1xf32> to vector<16x8xf32>
    %82 = arith.subf %78, %81 : vector<16x8xf32>
    %83 = math.exp %82 : vector<16x8xf32>
    %cst_31 = arith.constant dense<0.000000e+00> : vector<16xf32>
    %84 = vector.multi_reduction <add>, %83, %cst_31 [1] : vector<16x8xf32> to vector<16xf32>
    %85 = vector.shape_cast %84 : vector<16xf32> to vector<16x1xf32>
    %86 = vector.broadcast %85 : vector<16x1xf32> to vector<16x8xf32>
    %87 = arith.divf %83, %86 : vector<16x8xf32>
    %88 = arith.truncf %87 : vector<16x8xf32> to vector<16x8xbf16>
    %89 = arith.truncf %72 : vector<8x8xf32> to vector<8x8xbf16>
    %cst_32 = arith.constant dense<0.000000e+00> : vector<16x8xf32>
    %90 = tpu.matmul %88, %89, %cst_32 {dimension_numbers = #tpu.dot_dimension_numbers<[1], [0], [0], [1], [0, 0, 1, 1], [], []>} : vector<16x8xbf16>, vector<8x8xbf16>, vector<16x8xf32> -> vector<16x8xf32>
    %91 = vector.extract_strided_slice %90 {offsets = [0, 0], sizes = [8, 8], strides = [1, 1]} : vector<16x8xf32> to vector<8x8xf32>
    %c0_33 = arith.constant 0 : index
    %c0_34 = arith.constant 0 : index
    %c0_35 = arith.constant 0 : index
    %92 = vector.load %arg12[%c0_33, %c0_34, %c0_35] : memref<8x2x32xf32, #tpu.memory_space<vmem>>, vector<8x1x8xf32>
    %93 = vector.shape_cast %92 : vector<8x1x8xf32> to vector<8x8xf32>
    %94 = vector.shape_cast %91 : vector<8x8xf32> to vector<8x1x8xf32>
    tpu.vector_store %arg12[%c0_33, %c0_34, %c0_35], %94 {strides = array<i32>} : memref<8x2x32xf32, #tpu.memory_space<vmem>>, vector<8x1x8xf32>,
    %95 = vector.extract_strided_slice %90 {offsets = [8, 0], sizes = [8, 8], strides = [1, 1]} : vector<16x8xf32> to vector<8x8xf32>
    %c0_36 = arith.constant 0 : index
    %c0_37 = arith.constant 0 : index
    %c8 = arith.constant 8 : index
    %96 = vector.load %arg12[%c0_36, %c0_37, %c8] : memref<8x2x32xf32, #tpu.memory_space<vmem>>, vector<8x1x8xf32>
    %97 = vector.shape_cast %96 : vector<8x1x8xf32> to vector<8x8xf32>
    %98 = vector.shape_cast %95 : vector<8x8xf32> to vector<8x1x8xf32>
    tpu.vector_store %arg12[%c0_36, %c0_37, %c8], %98 {strides = array<i32>} : memref<8x2x32xf32, #tpu.memory_space<vmem>>, vector<8x1x8xf32>,
    %99 = vector.extract_strided_slice %54 {offsets = [0, 0, 16], sizes = [8, 1, 8], strides = [1, 1, 1]} : vector<8x2x32xf32> to vector<8x1x8xf32>
    %100 = vector.shape_cast %99 : vector<8x1x8xf32> to vector<8x8xf32>
    %101 = vector.extract_strided_slice %54 {offsets = [0, 0, 24], sizes = [8, 1, 8], strides = [1, 1, 1]} : vector<8x2x32xf32> to vector<8x1x8xf32>
    %102 = vector.shape_cast %101 : vector<8x1x8xf32> to vector<8x8xf32>
    %103 = tpu.concatenate %100, %102 in 0 : vector<8x8xf32>, vector<8x8xf32> -> vector<16x8xf32>
    %104 = vector.extract_strided_slice %55 {offsets = [0, 0, 8], sizes = [8, 1, 8], strides = [1, 1, 1]} : vector<8x2x16xf32> to vector<8x1x8xf32>
    %105 = vector.shape_cast %104 : vector<8x1x8xf32> to vector<8x8xf32>
    %106 = vector.extract_strided_slice %56 {offsets = [0, 0, 8], sizes = [8, 1, 8], strides = [1, 1, 1]} : vector<8x2x16xf32> to vector<8x1x8xf32>
    %107 = vector.shape_cast %106 : vector<8x1x8xf32> to vector<8x8xf32>
    %108 = arith.truncf %103 : vector<16x8xf32> to vector<16x8xbf16>
    %109 = arith.truncf %105 : vector<8x8xf32> to vector<8x8xbf16>
    %cst_38 = arith.constant dense<0.000000e+00> : vector<16x8xf32>
    %110 = tpu.matmul %108, %109, %cst_38 {dimension_numbers = #tpu.dot_dimension_numbers<[1], [1], [0], [0], [0, 0, 1, 0], [], []>} : vector<16x8xbf16>, vector<8x8xbf16>, vector<16x8xf32> -> vector<16x8xf32>
    %cst_39 = arith.constant 0.353553385 : f32
    %111 = vector.broadcast %cst_39 : f32 to vector<16x8xf32>
    %112 = arith.mulf %110, %111 : vector<16x8xf32>
    %113 = arith.addf %112, %63 : vector<16x8xf32>
    %cst_40 = arith.constant dense<0xFF800000> : vector<16xf32>
    %114 = vector.multi_reduction <maximumf>, %113, %cst_40 [1] : vector<16x8xf32> to vector<16xf32>
    %115 = vector.shape_cast %114 : vector<16xf32> to vector<16x1xf32>
    %116 = vector.broadcast %115 : vector<16x1xf32> to vector<16x8xf32>
    %117 = arith.subf %113, %116 : vector<16x8xf32>
    %118 = math.exp %117 : vector<16x8xf32>
    %cst_41 = arith.constant dense<0.000000e+00> : vector<16xf32>
    %119 = vector.multi_reduction <add>, %118, %cst_41 [1] : vector<16x8xf32> to vector<16xf32>
    %120 = vector.shape_cast %119 : vector<16xf32> to vector<16x1xf32>
    %121 = vector.broadcast %120 : vector<16x1xf32> to vector<16x8xf32>
    %122 = arith.divf %118, %121 : vector<16x8xf32>
    %123 = arith.truncf %122 : vector<16x8xf32> to vector<16x8xbf16>
    %124 = arith.truncf %107 : vector<8x8xf32> to vector<8x8xbf16>
    %cst_42 = arith.constant dense<0.000000e+00> : vector<16x8xf32>
    %125 = tpu.matmul %123, %124, %cst_42 {dimension_numbers = #tpu.dot_dimension_numbers<[1], [0], [0], [1], [0, 0, 1, 1], [], []>} : vector<16x8xbf16>, vector<8x8xbf16>, vector<16x8xf32> -> vector<16x8xf32>
    %126 = vector.extract_strided_slice %125 {offsets = [0, 0], sizes = [8, 8], strides = [1, 1]} : vector<16x8xf32> to vector<8x8xf32>
    %c0_43 = arith.constant 0 : index
    %c0_44 = arith.constant 0 : index
    %c16 = arith.constant 16 : index
    %127 = vector.load %arg12[%c0_43, %c0_44, %c16] : memref<8x2x32xf32, #tpu.memory_space<vmem>>, vector<8x1x8xf32>
    %128 = vector.shape_cast %127 : vector<8x1x8xf32> to vector<8x8xf32>
    %129 = vector.shape_cast %126 : vector<8x8xf32> to vector<8x1x8xf32>
    tpu.vector_store %arg12[%c0_43, %c0_44, %c16], %129 {strides = array<i32>} : memref<8x2x32xf32, #tpu.memory_space<vmem>>, vector<8x1x8xf32>,
    %130 = vector.extract_strided_slice %125 {offsets = [8, 0], sizes = [8, 8], strides = [1, 1]} : vector<16x8xf32> to vector<8x8xf32>
    %c0_45 = arith.constant 0 : index
    %c0_46 = arith.constant 0 : index
    %c24 = arith.constant 24 : index
    %131 = vector.load %arg12[%c0_45, %c0_46, %c24] : memref<8x2x32xf32, #tpu.memory_space<vmem>>, vector<8x1x8xf32>
    %132 = vector.shape_cast %131 : vector<8x1x8xf32> to vector<8x8xf32>
    %133 = vector.shape_cast %130 : vector<8x8xf32> to vector<8x1x8xf32>
    tpu.vector_store %arg12[%c0_45, %c0_46, %c24], %133 {strides = array<i32>} : memref<8x2x32xf32, #tpu.memory_space<vmem>>, vector<8x1x8xf32>,
    %134 = vector.extract_strided_slice %54 {offsets = [0, 1, 0], sizes = [8, 1, 8], strides = [1, 1, 1]} : vector<8x2x32xf32> to vector<8x1x8xf32>
    %135 = vector.shape_cast %134 : vector<8x1x8xf32> to vector<8x8xf32>
    %136 = vector.extract_strided_slice %54 {offsets = [0, 1, 8], sizes = [8, 1, 8], strides = [1, 1, 1]} : vector<8x2x32xf32> to vector<8x1x8xf32>
    %137 = vector.shape_cast %136 : vector<8x1x8xf32> to vector<8x8xf32>
    %138 = tpu.concatenate %135, %137 in 0 : vector<8x8xf32>, vector<8x8xf32> -> vector<16x8xf32>
    %139 = vector.extract_strided_slice %55 {offsets = [0, 1, 0], sizes = [8, 1, 8], strides = [1, 1, 1]} : vector<8x2x16xf32> to vector<8x1x8xf32>
    %140 = vector.shape_cast %139 : vector<8x1x8xf32> to vector<8x8xf32>
    %141 = vector.extract_strided_slice %56 {offsets = [0, 1, 0], sizes = [8, 1, 8], strides = [1, 1, 1]} : vector<8x2x16xf32> to vector<8x1x8xf32>
    %142 = vector.shape_cast %141 : vector<8x1x8xf32> to vector<8x8xf32>
    %143 = arith.truncf %138 : vector<16x8xf32> to vector<16x8xbf16>
    %144 = arith.truncf %140 : vector<8x8xf32> to vector<8x8xbf16>
    %cst_47 = arith.constant dense<0.000000e+00> : vector<16x8xf32>
    %145 = tpu.matmul %143, %144, %cst_47 {dimension_numbers = #tpu.dot_dimension_numbers<[1], [1], [0], [0], [0, 0, 1, 0], [], []>} : vector<16x8xbf16>, vector<8x8xbf16>, vector<16x8xf32> -> vector<16x8xf32>
    %cst_48 = arith.constant 0.353553385 : f32
    %146 = vector.broadcast %cst_48 : f32 to vector<16x8xf32>
    %147 = arith.mulf %145, %146 : vector<16x8xf32>
    %148 = arith.addf %147, %63 : vector<16x8xf32>
    %cst_49 = arith.constant dense<0xFF800000> : vector<16xf32>
    %149 = vector.multi_reduction <maximumf>, %148, %cst_49 [1] : vector<16x8xf32> to vector<16xf32>
    %150 = vector.shape_cast %149 : vector<16xf32> to vector<16x1xf32>
    %151 = vector.broadcast %150 : vector<16x1xf32> to vector<16x8xf32>
    %152 = arith.subf %148, %151 : vector<16x8xf32>
    %153 = math.exp %152 : vector<16x8xf32>
    %cst_50 = arith.constant dense<0.000000e+00> : vector<16xf32>
    %154 = vector.multi_reduction <add>, %153, %cst_50 [1] : vector<16x8xf32> to vector<16xf32>
    %155 = vector.shape_cast %154 : vector<16xf32> to vector<16x1xf32>
    %156 = vector.broadcast %155 : vector<16x1xf32> to vector<16x8xf32>
    %157 = arith.divf %153, %156 : vector<16x8xf32>
    %158 = arith.truncf %157 : vector<16x8xf32> to vector<16x8xbf16>
    %159 = arith.truncf %142 : vector<8x8xf32> to vector<8x8xbf16>
    %cst_51 = arith.constant dense<0.000000e+00> : vector<16x8xf32>
    %160 = tpu.matmul %158, %159, %cst_51 {dimension_numbers = #tpu.dot_dimension_numbers<[1], [0], [0], [1], [0, 0, 1, 1], [], []>} : vector<16x8xbf16>, vector<8x8xbf16>, vector<16x8xf32> -> vector<16x8xf32>
    %161 = vector.extract_strided_slice %160 {offsets = [0, 0], sizes = [8, 8], strides = [1, 1]} : vector<16x8xf32> to vector<8x8xf32>
    %c0_52 = arith.constant 0 : index
    %c1_53 = arith.constant 1 : index
    %c0_54 = arith.constant 0 : index
    %162 = vector.load %arg12[%c0_52, %c1_53, %c0_54] : memref<8x2x32xf32, #tpu.memory_space<vmem>>, vector<8x1x8xf32>
    %163 = vector.shape_cast %162 : vector<8x1x8xf32> to vector<8x8xf32>
    %164 = vector.shape_cast %161 : vector<8x8xf32> to vector<8x1x8xf32>
    tpu.vector_store %arg12[%c0_52, %c1_53, %c0_54], %164 {strides = array<i32>} : memref<8x2x32xf32, #tpu.memory_space<vmem>>, vector<8x1x8xf32>,
    %165 = vector.extract_strided_slice %160 {offsets = [8, 0], sizes = [8, 8], strides = [1, 1]} : vector<16x8xf32> to vector<8x8xf32>
    %c0_55 = arith.constant 0 : index
    %c1_56 = arith.constant 1 : index
    %c8_57 = arith.constant 8 : index
    %166 = vector.load %arg12[%c0_55, %c1_56, %c8_57] : memref<8x2x32xf32, #tpu.memory_space<vmem>>, vector<8x1x8xf32>
    %167 = vector.shape_cast %166 : vector<8x1x8xf32> to vector<8x8xf32>
    %168 = vector.shape_cast %165 : vector<8x8xf32> to vector<8x1x8xf32>
    tpu.vector_store %arg12[%c0_55, %c1_56, %c8_57], %168 {strides = array<i32>} : memref<8x2x32xf32, #tpu.memory_space<vmem>>, vector<8x1x8xf32>,
    %169 = vector.extract_strided_slice %54 {offsets = [0, 1, 16], sizes = [8, 1, 8], strides = [1, 1, 1]} : vector<8x2x32xf32> to vector<8x1x8xf32>
    %170 = vector.shape_cast %169 : vector<8x1x8xf32> to vector<8x8xf32>
    %171 = vector.extract_strided_slice %54 {offsets = [0, 1, 24], sizes = [8, 1, 8], strides = [1, 1, 1]} : vector<8x2x32xf32> to vector<8x1x8xf32>
    %172 = vector.shape_cast %171 : vector<8x1x8xf32> to vector<8x8xf32>
    %173 = tpu.concatenate %170, %172 in 0 : vector<8x8xf32>, vector<8x8xf32> -> vector<16x8xf32>
    %174 = vector.extract_strided_slice %55 {offsets = [0, 1, 8], sizes = [8, 1, 8], strides = [1, 1, 1]} : vector<8x2x16xf32> to vector<8x1x8xf32>
    %175 = vector.shape_cast %174 : vector<8x1x8xf32> to vector<8x8xf32>
    %176 = vector.extract_strided_slice %56 {offsets = [0, 1, 8], sizes = [8, 1, 8], strides = [1, 1, 1]} : vector<8x2x16xf32> to vector<8x1x8xf32>
    %177 = vector.shape_cast %176 : vector<8x1x8xf32> to vector<8x8xf32>
    %178 = arith.truncf %173 : vector<16x8xf32> to vector<16x8xbf16>
    %179 = arith.truncf %175 : vector<8x8xf32> to vector<8x8xbf16>
    %cst_58 = arith.constant dense<0.000000e+00> : vector<16x8xf32>
    %180 = tpu.matmul %178, %179, %cst_58 {dimension_numbers = #tpu.dot_dimension_numbers<[1], [1], [0], [0], [0, 0, 1, 0], [], []>} : vector<16x8xbf16>, vector<8x8xbf16>, vector<16x8xf32> -> vector<16x8xf32>
    %cst_59 = arith.constant 0.353553385 : f32
    %181 = vector.broadcast %cst_59 : f32 to vector<16x8xf32>
    %182 = arith.mulf %180, %181 : vector<16x8xf32>
    %183 = arith.addf %182, %63 : vector<16x8xf32>
    %cst_60 = arith.constant dense<0xFF800000> : vector<16xf32>
    %184 = vector.multi_reduction <maximumf>, %183, %cst_60 [1] : vector<16x8xf32> to vector<16xf32>
    %185 = vector.shape_cast %184 : vector<16xf32> to vector<16x1xf32>
    %186 = vector.broadcast %185 : vector<16x1xf32> to vector<16x8xf32>
    %187 = arith.subf %183, %186 : vector<16x8xf32>
    %188 = math.exp %187 : vector<16x8xf32>
    %cst_61 = arith.constant dense<0.000000e+00> : vector<16xf32>
    %189 = vector.multi_reduction <add>, %188, %cst_61 [1] : vector<16x8xf32> to vector<16xf32>
    %190 = vector.shape_cast %189 : vector<16xf32> to vector<16x1xf32>
    %191 = vector.broadcast %190 : vector<16x1xf32> to vector<16x8xf32>
    %192 = arith.divf %188, %191 : vector<16x8xf32>
    %193 = arith.truncf %192 : vector<16x8xf32> to vector<16x8xbf16>
    %194 = arith.truncf %177 : vector<8x8xf32> to vector<8x8xbf16>
    %cst_62 = arith.constant dense<0.000000e+00> : vector<16x8xf32>
    %195 = tpu.matmul %193, %194, %cst_62 {dimension_numbers = #tpu.dot_dimension_numbers<[1], [0], [0], [1], [0, 0, 1, 1], [], []>} : vector<16x8xbf16>, vector<8x8xbf16>, vector<16x8xf32> -> vector<16x8xf32>
    %196 = vector.extract_strided_slice %195 {offsets = [0, 0], sizes = [8, 8], strides = [1, 1]} : vector<16x8xf32> to vector<8x8xf32>
    %c0_63 = arith.constant 0 : index
    %c1_64 = arith.constant 1 : index
    %c16_65 = arith.constant 16 : index
    %197 = vector.load %arg12[%c0_63, %c1_64, %c16_65] : memref<8x2x32xf32, #tpu.memory_space<vmem>>, vector<8x1x8xf32>
    %198 = vector.shape_cast %197 : vector<8x1x8xf32> to vector<8x8xf32>
    %199 = vector.shape_cast %196 : vector<8x8xf32> to vector<8x1x8xf32>
    tpu.vector_store %arg12[%c0_63, %c1_64, %c16_65], %199 {strides = array<i32>} : memref<8x2x32xf32, #tpu.memory_space<vmem>>, vector<8x1x8xf32>,
    %200 = vector.extract_strided_slice %195 {offsets = [8, 0], sizes = [8, 8], strides = [1, 1]} : vector<16x8xf32> to vector<8x8xf32>
    %c0_66 = arith.constant 0 : index
    %c1_67 = arith.constant 1 : index
    %c24_68 = arith.constant 24 : index
    %201 = vector.load %arg12[%c0_66, %c1_67, %c24_68] : memref<8x2x32xf32, #tpu.memory_space<vmem>>, vector<8x1x8xf32>
    %202 = vector.shape_cast %201 : vector<8x1x8xf32> to vector<8x8xf32>
    %203 = vector.shape_cast %200 : vector<8x8xf32> to vector<8x1x8xf32>
    tpu.vector_store %arg12[%c0_66, %c1_67, %c24_68], %203 {strides = array<i32>} : memref<8x2x32xf32, #tpu.memory_space<vmem>>, vector<8x1x8xf32>,
    %c0_69 = arith.constant 0 : index
    %c0_70 = arith.constant 0 : index
    %c0_71 = arith.constant 0 : index
    %204 = vector.load %arg12[%c0_69, %c0_70, %c0_71] : memref<8x2x32xf32, #tpu.memory_space<vmem>>, vector<8x2x32xf32>
    %205 = vector.shape_cast %204 : vector<8x2x32xf32> to vector<16x32xf32>
    %206 = arith.truncf %205 : vector<16x32xf32> to vector<16x32xbf16>
    %c0_72 = arith.constant 0 : index
    %c0_73 = arith.constant 0 : index
    %207 = vector.load %arg6[%c0_72, %c0_73] : memref<32x32xbf16, #tpu.memory_space<vmem>>, vector<32x32xbf16>
    %cst_74 = arith.constant dense<0.000000e+00> : vector<16x32xf32>
    %208 = tpu.matmul %206, %207, %cst_74 {dimension_numbers = #tpu.dot_dimension_numbers<[1], [0], [0], [1], [0, 0, 1, 1], [], []>} : vector<16x32xbf16>, vector<32x32xbf16>, vector<16x32xf32> -> vector<16x32xf32>
    %209 = arith.addf %0, %208 : vector<16x32xf32>
    %210 = arith.mulf %209, %209 : vector<16x32xf32>
    %cst_75 = arith.constant dense<0.000000e+00> : vector<16xf32>
    %211 = vector.multi_reduction <add>, %210, %cst_75 [1] : vector<16x32xf32> to vector<16xf32>
    %212 = vector.shape_cast %211 : vector<16xf32> to vector<16x1xf32>
    %cst_76 = arith.constant 3.200000e+01 : f32
    %213 = vector.broadcast %cst_76 : f32 to vector<16x1xf32>
    %214 = arith.divf %212, %213 : vector<16x1xf32>
    %c1_77 = arith.constant 1 : index
    %c0_78 = arith.constant 0 : index
    %215 = vector.load %arg1[%c1_77, %c0_78] : memref<2x32xf32, #tpu.memory_space<vmem>>, vector<1x32xf32>
    %cst_79 = arith.constant 9.99999974E-6 : f32
    %216 = vector.broadcast %cst_79 : f32 to vector<16x1xf32>
    %217 = arith.addf %214, %216 : vector<16x1xf32>
    %218 = math.rsqrt %217 : vector<16x1xf32>
    %219 = vector.broadcast %218 : vector<16x1xf32> to vector<16x32xf32>
    %220 = arith.mulf %209, %219 : vector<16x32xf32>
    %221 = vector.broadcast %215 : vector<1x32xf32> to vector<16x32xf32>
    %222 = arith.mulf %221, %220 : vector<16x32xf32>
    %223 = arith.truncf %222 : vector<16x32xf32> to vector<16x32xbf16>
    %c0_80 = arith.constant 0 : index
    %c0_81 = arith.constant 0 : index
    %224 = vector.load %arg7[%c0_80, %c0_81] : memref<32x64xbf16, #tpu.memory_space<vmem>>, vector<32x64xbf16>
    %cst_82 = arith.constant dense<0.000000e+00> : vector<16x64xf32>
    %225 = tpu.matmul %223, %224, %cst_82 {dimension_numbers = #tpu.dot_dimension_numbers<[1], [0], [0], [1], [0, 0, 1, 1], [], []>} : vector<16x32xbf16>, vector<32x64xbf16>, vector<16x64xf32> -> vector<16x64xf32>
    %c0_83 = arith.constant 0 : index
    %c0_84 = arith.constant 0 : index
    %226 = vector.load %arg8[%c0_83, %c0_84] : memref<32x64xbf16, #tpu.memory_space<vmem>>, vector<32x64xbf16>
    %cst_85 = arith.constant dense<0.000000e+00> : vector<16x64xf32>
    %227 = tpu.matmul %223, %226, %cst_85 {dimension_numbers = #tpu.dot_dimension_numbers<[1], [0], [0], [1], [0, 0, 1, 1], [], []>} : vector<16x32xbf16>, vector<32x64xbf16>, vector<16x64xf32> -> vector<16x64xf32>
    %228 = arith.negf %225 : vector<16x64xf32>
    %229 = math.exp %228 : vector<16x64xf32>
    %cst_86 = arith.constant 1.000000e+00 : f32
    %230 = vector.broadcast %cst_86 : f32 to vector<16x64xf32>
    %231 = arith.addf %230, %229 : vector<16x64xf32>
    %232 = arith.divf %230, %231 : vector<16x64xf32>
    %233 = arith.mulf %225, %232 : vector<16x64xf32>
    %234 = arith.mulf %233, %227 : vector<16x64xf32>
    %235 = arith.truncf %234 : vector<16x64xf32> to vector<16x64xbf16>
    %c0_87 = arith.constant 0 : index
    %c0_88 = arith.constant 0 : index
    %236 = vector.load %arg9[%c0_87, %c0_88] : memref<64x32xbf16, #tpu.memory_space<vmem>>, vector<64x32xbf16>
    %cst_89 = arith.constant dense<0.000000e+00> : vector<16x32xf32>
    %237 = tpu.matmul %235, %236, %cst_89 {dimension_numbers = #tpu.dot_dimension_numbers<[1], [0], [0], [1], [0, 0, 1, 1], [], []>} : vector<16x64xbf16>, vector<64x32xbf16>, vector<16x32xf32> -> vector<16x32xf32>
    %238 = arith.addf %209, %237 : vector<16x32xf32>
    %c0_90 = arith.constant 0 : index
    %c0_91 = arith.constant 0 : index
    %239 = vector.load %arg10[%c0_90, %c0_91] : memref<16x32xf32, #tpu.memory_space<vmem>>, vector<16x32xf32>
    tpu.vector_store %arg10[%c0_90, %c0_91], %238 {strides = array<i32>} : memref<16x32xf32, #tpu.memory_space<vmem>>, vector<16x32xf32>,
    return
  }
}

</mosaic_0001>

<bundles_post_ra>
// kernel: neg.7
= control target key start
LH: loop header
LB: loop body
LE: loop exit
PB: predicated region body
PF: predicated region fallthrough
CT: control target
= control target key end

     0   :  { %s24_s0 = inlined_call_operand.vmem [shape: f32[8,2,1], index: 0, kind: input, shape index: {}]   ;;  %s25_s1 = inlined_call_operand.vmem [shape: f32[8,2,1], index: 1, kind: output, shape index: {}]  }
   0x1   :  { %v2_v0 = vld [vmem:[%s24_s0] sm:$0x3] }
   0x2   :  { %v5_v1 = vxor.u32 2147483648, %v2_v0 }
   0x4   :  { %7 = vst [vmem:[%s25_s1] sm:$0x3] %v5_v1 }

// kernel: tile.29
= control target key start
LH: loop header
LB: loop body
LE: loop exit
PB: predicated region body
PF: predicated region fallthrough
CT: control target
= control target key end

     0   :  { %vm43_vm0 = vcmask 1047556   ;;  %vm45_vm1 = vcmask 64512   ;;  %s94_s22 = smov 8   ;;  %s95_s25 = smov 16   ;;  %vm55_vm2 = vcmask 261312   ;;  %vm65_vm3 = vcmask 195712   ;;  %s147_s0 = inlined_call_operand.vmem [shape: f32[8,4,8], index: 0, kind: input, shape index: {}]   ;;  %s148_s1 = inlined_call_operand.vmem [shape: f32[8,32], index: 1, kind: output, shape index: {}]  }
   0x1   :  { %v83_v0 = vld [vmem:[%s147_s0 + $0x1c] sm:$0xf]  ;;  %v84_v1 = vld [vmem:[%s147_s0 + $0x18] sm:$0xf]  ;;  %v85_v2 = vld [vmem:[%s147_s0 + $0x14] sm:$0xf] }
   0x2   :  { %9 = vst [vmem:[#allocation0 + $0x38] sm:$0xf] %v83_v0  ;;  %14 = vst [vmem:[#allocation0 + $0x30] sm:$0xf] %v84_v1  ;;  %v86_v3 = vld [vmem:[%s147_s0 + $0x10] sm:$0xf] }
   0x3   :  { %19 = vst [vmem:[#allocation0 + $0x28] sm:$0xf] %v85_v2  ;;  %v87_v4 = vld [vmem:[%s147_s0 + $0xc] sm:$0xf]  ;;  %v88_v5 = vld [vmem:[%s147_s0 + $0x8] sm:$0xf] }
   0x4   :  { %24 = vst [vmem:[#allocation0 + $0x20] sm:$0xf] %v86_v3  ;;  %29 = vst [vmem:[#allocation0 + $0x18] sm:$0xf] %v87_v4  ;;  %v89_v6 = vld [vmem:[%s147_s0 + $0x4] sm:$0xf] }
   0x5   :  { %34 = vst [vmem:[#allocation0 + $0x10] sm:$0xf] %v88_v5  ;;  %v39_v7 = vld [vmem:[%s147_s0] sm:$0xf]  ;;  %38 = vst [vmem:[#allocation0 + $0x8] sm:$0xf] %v89_v6 }
   0x6   :  { %40 = vst [vmem:[#allocation0] sm:$0xf] %v39_v7  ;;  %s93_s0 = smov 24   ;;  %vm75_vm4 = vcmask 130112  }
   0xb   :  { %v50_v8 = vld [vmem:[#allocation0 + $0x3] ss:$8 sm:$0xf0]   ;;  %v60_v9 = vld [vmem:[#allocation0 + $0x2] ss:$8 sm:$0xf0]  }
   0xc   :  { %v70_v14 = vld [vmem:[#allocation0 + $0x1] ss:$8 sm:$0xf0]   ;;  %v42_v17 = vld [vmem:[#allocation0] ss:$8 sm:$0xf0]  }
   0xd   :  { %v48_v10 = vld [vmem:[#allocation0 + $0x3] ss:$8 sm:$0xf]   ;;  %v58_v11 = vld [vmem:[#allocation0 + $0x2] ss:$8 sm:$0xf]  }
   0xe   :  { %v52_v12 = vsel %vm43_vm0, %v50_v8, %v48_v10  ;;  %v68_v13 = vld [vmem:[#allocation0 + $0x1] ss:$8 sm:$0xf]   ;;  %v41_v16 = vld [vmem:[#allocation0] ss:$8 sm:$0xf]   ;;  %v62_v18 = vsel %vm43_vm0, %v60_v9, %v58_v11 }
   0xf   :  { %53 = vrot.lane.b32.xlu0 %v52_v12, %s93_s0  ;;  %v72_v15 = vsel %vm43_vm0, %v70_v14, %v68_v13  ;;  %v44_v19 = vsel %vm43_vm0, %v42_v17, %v41_v16 }
  0x10   :  { %73 = vrot.lane.b32.xlu1 %v72_v15, %s94_s22  ;;  %46 = vst.msk [vmem:[%s148_s1] sm:$0xff] %vm45_vm1, %v44_v19  }
  0x13   :  { %63 = vrot.lane.b32.xlu0 %v62_v18, %s95_s25 }
  0x81   :  { %v54_v20 = vpop.permute.xlu0 %53  }
  0x82   :  { %56 = vst.msk [vmem:[%s148_s1] sm:$0xff] %vm55_vm2, %v54_v20   ;;  %v74_v21 = vpop.permute.xlu1 %73  }
  0x85   :  { %v64_v22 = vpop.permute.xlu0 %63  }
  0x86   :  { %66 = vst.msk [vmem:[%s148_s1] sm:$0xff] %vm65_vm3, %v64_v22  }
  0x87   :  { %76 = vst.msk [vmem:[%s148_s1] sm:$0xff] %vm75_vm4, %v74_v21  }

// kernel: glm_block_forward.1
= control target key start
LH: loop header
LB: loop body
LE: loop exit
PB: predicated region body
PF: predicated region fallthrough
CT: control target
= control target key end

     0   :  { %vm43_vm0 = vcmask 261120   ;;  %s3382_s0 = inlined_call_operand.vmem [shape: f32[16,32], index: 0, kind: input, shape index: {}]   ;;  %s3383_s1 = inlined_call_operand.vmem [shape: f32[2,32], index: 1, kind: input, shape index: {}]   ;;  %s3384_s2 = inlined_call_operand.vmem [shape: f32[3,16,32], index: 2, kind: input, shape index: {}]   ;;  %s3385_s3 = inlined_call_operand.vmem [shape: bf16[33,32], index: 3, kind: input, shape index: {}]   ;;  %s3386_s4 = inlined_call_operand.vmem [shape: bf16[33,16], index: 4, kind: input, shape index: {}]   ;;  %s3387_s5 = inlined_call_operand.vmem [shape: bf16[33,16], index: 5, kind: input, shape index: {}]   ;;  %s3388_s6 = inlined_call_operand.vmem [shape: bf16[32,32], index: 6, kind: input, shape index: {}]   ;;  %s3389_s7 = inlined_call_operand.vmem [shape: bf16[32,64], index: 7, kind: input, shape index: {}]   ;;  %s3390_s8 = inlined_call_operand.vmem [shape: bf16[32,64], index: 8, kind: input, shape index: {}]   ;;  %s3391_s9 = inlined_call_operand.vmem [shape: bf16[64,32], index: 9, kind: input, shape index: {}]   ;;  %s3392_s10 = inlined_call_operand.hbm [shape: f32[16,32], index: 10, kind: output, shape index: {0}]   ;;  %s3393_s11 = inlined_call_operand.vmem [shape: f32[16,32], index: 11, kind: output, shape index: {1}]  }
   0x1   :  { %v39_v0 = vld [vmem:[%s3382_s0] sm:$0xff]  ;;  %v40_v1 = vld [vmem:[%s3382_s0 + $0x8] sm:$0xff] }
   0x2   :  { %v41_v2 = vmul.f32 %v39_v0, %v39_v0  ;;  %v42_v3 = vmul.f32 %v40_v1, %v40_v1 }
   0x4   :  { %v44_v4 = vsel %vm43_vm0, %v41_v2, 0.0  ;;  %v47_v5 = vsel %vm43_vm0, %v42_v3, 0.0 }
   0x5   :  { %45 = vadd.xlane.f32.xlu0 %v44_v4 }
   0x9   :  { %48 = vadd.xlane.f32.xlu0 %v47_v5 }
   0xa   :  { %17 = vsyncpa [#allocation4], 0  ;;  %v2586_v6 = vld [vmem:[%s3385_s3 + $0x10] ss:$0 sps:$4 sm:$0x11]   ;;  %vm93_vm1 = vcmask 1040384   ;;  %v354_v41 = vlaneseq }
   0xb   :  { %v2677_v7 = vmov 0.0   ;;  %v2678_v8 = vmov 0   ;;  %v2588_v11 = vld [vmem:[%s3386_s4 + $0x10] ss:$0 sps:$4 sm:$0x11]   ;;  %vm2679_vm2 = vmmov 0  }
   0xc   :  { %2457 = vmatprep.subr.bf16.mxu0 %v2677_v7  ;;  %v95_v9 = vsel %vm93_vm1, 65535, %v2678_v8  ;;  %2467 = vmatprep.subr.bf16.mxu1 %v2677_v7  ;;  %v2589_v13 = vld [vmem:[%s3385_s3 + $0x8] sm:$0xff]   ;;  %v2591_v15 = vld [vmem:[%s3385_s3] sm:$0xff]   ;;  %v2587_v27 = vld [vmem:[%s3387_s5 + $0x10] ss:$0 sps:$4 sm:$0x11]  }
   0xd   :  { %v97_v10 = vand.u32 %v2586_v6, %v95_v9  ;;  %2463 = vmatprep.mubr.msk.bf16.mxu0 %vm2679_vm2, %v2677_v7  ;;  %2473 = vmatprep.mubr.msk.bf16.mxu1 %vm2679_vm2, %v2677_v7  ;;  %v161_v12 = vand.u32 %v2588_v11, %v95_v9  ;;  %v2590_v14 = vld [vmem:[%s3386_s4 + $0x8] sm:$0xff]   ;;  %v2592_v16 = vld [vmem:[%s3386_s4] sm:$0xff]   ;;  %v225_v31 = vand.u32 %v2587_v27, %v95_v9  ;;  %vm89_vm3 = vcmask 269312   ;;  %s2680_s20 = smov 127   ;;  %s2684_s3 = smov 112  }
   0xe   :  { %v2373_v25 = vld [vmem:[%s3383_s1] ss:$0 sm:$0xff]  ;;  %v2593_v35 = vld [vmem:[%s3387_s5 + $0x8] sm:$0xff]   ;;  %v2681_v39 = vmov 1983009808   ;;  %v2828_v47 = vshrl.u32 %v354_v41, 7 }
   0xf   :  { %2458 = vmatpush3.bf16.msra.mxu0 %v97_v10  ;;  %2468 = vmatpush3.bf16.msra.mxu1 %v161_v12  ;;  %v2594_v36 = vld [vmem:[%s3387_s5] sm:$0xff]   ;;  %v352_v40 = vunpack.c.l.s4 %v2681_v39  ;;  %s2682_s5 = smov 1   ;;  %vm508_vm4 = vcmask 1041409   ;;  %vm510_vm5 = vcmask 1042434   ;;  %vm512_vm6 = vcmask 1043459   ;;  %s2687_s4 = smov 8  }
  0x10   :  { %2459 = vmatprep.subr.bf16.mxu0 %v2677_v7  ;;  %2469 = vmatprep.subr.bf16.mxu1 %v2677_v7  ;;  %vm514_vm7 = vcmask 1044484   ;;  %vm516_vm8 = vcmask 1045509   ;;  %vm518_vm9 = vcmask 1046534   ;;  %vm520_vm10 = vcmask 1047559   ;;  %s2688_s14 = smov 16   ;;  %s2689_s15 = smov 24  }
  0x11   :  { %v353_v46 = vunpack.c.0.s8 %v352_v40  ;;  %vm683_vm11 = vcmask 1043456   ;;  %vm284_vm12 = vcmask 252928   ;;  %vm293_vm13 = vcmask 7168  }
  0x12   :  { %vm314_vm14 = vcmask 121856   ;;  %vm566_vm15 = vcmask 64512  }
  0x13   :  { %2460 = vmatpush3.bf16.msra.mxu0 %v2589_v13  ;;  %2470 = vmatpush3.bf16.msra.mxu1 %v2590_v14  ;;  %v2833_v50 = vsub.s32 %v353_v46, %v2828_v47 }
  0x14   :  { %2461 = vmatprep.subr.bf16.mxu0 %v2677_v7  ;;  %2471 = vmatprep.subr.bf16.mxu1 %v2677_v7 }
  0x17   :  { %2462 = vmatpush3.bf16.msra.mxu0 %v2591_v15  ;;  %2472 = vmatpush3.bf16.msra.mxu1 %v2592_v16 }
  0x18   :  { %2477 = vmatprep.subr.bf16.mxu0 %v2677_v7  ;;  %2493 = vmatprep.subr.bf16.mxu1 %v2677_v7 }
  0x8e   :  { %v46_v17 = vpop.xlane.xlu0 %45 }
  0x8f   :  { %v51_v18 = vmul.f32 0.03125, %v46_v17 }
  0x91   :  { %v54_v19 = vadd.f32 1e-05, %v51_v18 }
  0x92   :  { %v49_v20 = vpop.xlane.xlu0 %48 }
  0x93   :  { %2605 = vrsqrt.f32 %v54_v19  ;;  %v52_v21 = vmul.f32 0.03125, %v49_v20 }
  0x95   :  { %v55_v22 = vadd.f32 1e-05, %v52_v21 }
  0x97   :  { %2607 = vrsqrt.f32 %v55_v22 }
  0xa0   :  { %v2606_v23 = vpop.eup %2605 }
  0xa1   :  { %v58_v24 = vmul.f32 %v2606_v23, %v39_v0 }
  0xa3   :  { %v64_v29 = vmul.f32 %v2373_v25, %v58_v24 }
  0xa4   :  { %v2608_v26 = vpop.eup %2607 }
  0xa5   :  { %v59_v28 = vmul.f32 %v2608_v26, %v40_v1  ;;  %v66_v32 = vsel %vm43_vm0, %v64_v29, 1.0 }
  0xa7   :  { %v65_v30 = vmul.f32 %v2373_v25, %v59_v28 }
  0xa9   :  { %v67_v33 = vsel %vm43_vm0, %v65_v30, 1.0 }
  0xaa   :  { %v68_v34 = vpack.c.bf16 %v67_v33, %v66_v32 }
  0xac   :  { %2464 = vmatmul.mubr.msk.bf16.vlgmr.msra.gmra.mxu0 %vm89_vm3, %v68_v34  ;;  %2474 = vmatmul.mubr.msk.bf16.vlgmr.msra.gmra.mxu1 %vm89_vm3, %v68_v34 }
  0xad   :  { %2478 = vmatpush3.bf16.msra.mxu0 %v225_v31  ;;  %2483 = vmatprep.mubr.msk.bf16.mxu0 %vm2679_vm2, %v2677_v7 }
  0xae   :  { %2479 = vmatprep.subr.bf16.mxu0 %v2677_v7  ;;  %2495 = vmatprep.mubr.msk.bf16.mxu1 %vm2679_vm2, %v2677_v7 }
  0xb1   :  { %2480 = vmatpush3.bf16.msra.mxu0 %v2593_v35 }
  0xb2   :  { %2481 = vmatprep.subr.bf16.mxu0 %v2677_v7 }
  0xb5   :  { %2482 = vmatpush3.bf16.msra.mxu0 %v2594_v36 }
  0xb6   :  { %2487 = vmatprep.subr.bf16.mxu0 %v2677_v7 }
  0xb8   :  { %2484 = vmatmul.mubr.msk.bf16.vlgmr.msra.gmra.mxu0 %vm89_vm3, %v68_v34  ;;  %vm786_vm3 = vcmask 57344  }
  0xb9   :  { %2489 = vmatprep.mubr.msk.bf16.mxu0 %vm2679_vm2, %v2677_v7 }
 0x16c   :  { %v2813_v37 = vpop.f32.mrf.mxu0  ;;  %v2815_v38 = vpop.f32.mrf.mxu1 }
 0x16d   :  { %278 = vrot.lane.b32.xlu1 %v2813_v37, %s2680_s20 }
 0x16e   :  { %v2465_v42 = vpop.f32.mrf.mxu0  ;;  %v2475_v43 = vpop.f32.mrf.mxu1 }
 0x170   :  { %v2819_v44 = vpop.f32.mrf.mxu0  ;;  %v2821_v45 = vpop.f32.mrf.mxu1 }
 0x171   :  { %287 = vrot.lane.b32.xlu1 %v2813_v37, %s2682_s5  ;;  %280 = vrot.lane.b32.xlu0 %v2819_v44, %s2680_s20 }
 0x172   :  { %v2466_v48 = vpop.f32.mrf.mxu0  ;;  %v2476_v49 = vpop.f32.mrf.mxu1 }
 0x175   :  { %289 = vrot.lane.b32.xlu1 %v2819_v44, %s2682_s5 }
 0x178   :  { %v2835_v51 = vpop.f32.mrf.mxu0 }
 0x179   :  { %v428_v52 = vcombine.high %v2835_v51, %v2835_v51  ;;  %v435_v53 = vrot.slane %v2835_v51, %v2833_v50  ;;  %308 = vrot.lane.b32.xlu1 %v2815_v38, %s2680_s20 }
 0x17a   :  { %v2485_v54 = vpop.f32.mrf.mxu0 }
 0x17b   :  { %v442_v55 = vrot.slane %v428_v52, %v2833_v50  ;;  %v443_v56 = vcombine.high %v435_v53, %v435_v53  ;;  %v641_v57 = vpack.c.bf16 %v435_v53, %v435_v53 }
 0x17c   :  { %v2844_v58 = vpop.f32.mrf.mxu0 }
 0x17d   :  { %v444_v59 = vcombine.high %v442_v55, %v442_v55  ;;  %v642_v60 = vpack.c.bf16 %v443_v56, %v443_v56  ;;  %v643_v61 = vpack.c.bf16 %v442_v55, %v442_v55  ;;  %v657_v62 = vunpack.c.l.b16 %v641_v57  ;;  %317 = vrot.lane.b32.xlu1 %v2815_v38, %s2682_s5  ;;  %v2386_v56 = vld [vmem:[%s3384_s2 + $0x10] sm:$0xff] }
 0x17e   :  { %v445_v63 = vcombine.high %v2844_v58, %v2844_v58  ;;  %v452_v0 = vrot.slane %v2844_v58, %v2833_v50  ;;  %v2486_v1 = vpop.f32.mrf.mxu0 }
 0x17f   :  { %v644_v2 = vpack.c.bf16 %v444_v59, %v444_v59  ;;  %v658_v3 = vunpack.c.l.b16 %v642_v60  ;;  %v659_v4 = vunpack.c.l.b16 %v643_v61  ;;  %v1401_v5 = vrot.slane %v657_v62, 1  ;;  %v268_v59 = vld [vmem:[%s3384_s2] sm:$0xff]  ;;  %v2891_v1 = vld [vmem:[%s3384_s2 + $0x18] sm:$0xff] }
 0x180   :  { %v459_v6 = vrot.slane %v445_v63, %v2833_v50  ;;  %v460_v8 = vcombine.high %v452_v0, %v452_v0  ;;  %v645_v9 = vpack.c.bf16 %v452_v0, %v452_v0  ;;  %v296_v63 = vmul.f32 %v268_v59, %v2813_v37  ;;  %v2903_v37 = vld [vmem:[%s3384_s2 + $0x28] sm:$0xff] }
 0x181   :  { %v660_v10 = vunpack.c.l.b16 %v644_v2  ;;  %v665_v11 = vrot.slane %v658_v3, 7  ;;  %v667_v12 = vrot.slane %v659_v4, 6  ;;  %v1402_v13 = vsel %vm508_vm4, %v658_v3, %v1401_v5  ;;  %310 = vrot.lane.b32.xlu1 %v2821_v45, %s2680_s20  ;;  %v2897_v5 = vld [vmem:[%s3384_s2 + $0x8] sm:$0xff] }
 0x182   :  { %v1403_v14 = vrot.slane %v659_v4, 7  ;;  %v461_v15 = vcombine.high %v459_v6, %v459_v6  ;;  %v646_v16 = vpack.c.bf16 %v460_v8, %v460_v8  ;;  %v647_v17 = vpack.c.bf16 %v459_v6, %v459_v6 }
 0x183   :  { %v666_v18 = vsel %vm508_vm4, %v665_v11, %v657_v62  ;;  %v669_v19 = vrot.slane %v660_v10, 5  ;;  %v1405_v20 = vrot.slane %v660_v10, 6  ;;  %v661_v21 = vunpack.c.l.b16 %v645_v9  ;;  %v2388_v62 = vld [vmem:[%s3384_s2 + $0x20] sm:$0xff]  ;;  %s2683_s2 = smov 120  }
 0x184   :  { %v668_v22 = vsel %vm510_vm5, %v667_v12, %v666_v18  ;;  %v1404_v23 = vsel %vm510_vm5, %v1403_v14, %v1402_v13  ;;  %v648_v24 = vpack.c.bf16 %v461_v15, %v461_v15  ;;  %v662_v25 = vunpack.c.l.b16 %v646_v16 }
 0x185   :  { %v663_v26 = vunpack.c.l.b16 %v647_v17  ;;  %v671_v27 = vrot.slane %v661_v21, 4  ;;  %v1407_v28 = vrot.slane %v661_v21, 5  ;;  %319 = vrot.lane.b32.xlu1 %v2821_v45, %s2682_s5  ;;  %v670_v29 = vsel %vm512_vm6, %v669_v19, %v668_v22 }
 0x186   :  { %v664_v30 = vunpack.c.l.b16 %v648_v24  ;;  %v673_v31 = vrot.slane %v662_v25, 3  ;;  %v1409_v32 = vrot.slane %v662_v25, 4  ;;  %v1406_v33 = vsel %vm512_vm6, %v1405_v20, %v1404_v23 }
 0x187   :  { %v675_v34 = vrot.slane %v663_v26, 2  ;;  %v1411_v35 = vrot.slane %v663_v26, 3  ;;  %v672_v36 = vsel %vm514_vm7, %v671_v27, %v670_v29  ;;  %v1408_v39 = vsel %vm514_vm7, %v1407_v28, %v1406_v33 }
 0x188   :  { %v674_v40 = vsel %vm516_vm8, %v673_v31, %v672_v36  ;;  %v677_v42 = vrot.slane %v664_v30, 1  ;;  %v1410_v43 = vsel %vm516_vm8, %v1409_v32, %v1408_v39  ;;  %v1413_v46 = vrot.slane %v664_v30, 2 }
 0x189   :  { %v676_v48 = vsel %vm518_vm9, %v675_v34, %v674_v40  ;;  %v1412_v49 = vsel %vm518_vm9, %v1411_v35, %v1410_v43  ;;  %v297_v12 = vmul.f32 %v2897_v5, %v2819_v44  ;;  %v2908_v13 = vsub.s32 0, %v2828_v47 }
 0x18a   :  { %v678_v52 = vsel %vm520_vm10, %v677_v42, %v676_v48  ;;  %v2871_v53 = vsel %vm520_vm10, %v1413_v46, %v1412_v49  ;;  %v1270_v14 = vsub.s32 1, %v2828_v47  ;;  %v325_v20 = vmul.f32 %v268_v59, %v2815_v38 }
 0x18b   :  { %v2873_v54 = vpack.c.b16 %v678_v52, %v678_v52 }
 0x18d   :  { %v685_v55 = vsel %vm683_vm11, %v2873_v54, 0 }
 0x18e   :  { %2494 = vmatpush3.bf16.msra.mxu1 %v685_v55 }
 0x18f   :  { %2505 = vmatprep.subr.bf16.mxu1 %v2677_v7 }
 0x1df   :  { %v279_v57 = vpop.permute.xlu1 %278 }
 0x1e0   :  { %v285_v60 = vsel %vm284_vm12, %v279_v57, 0.0 }
 0x1e1   :  { %v298_v61 = vmul.f32 %v2386_v56, %v285_v60 }
 0x1e3   :  { %v288_v0 = vpop.permute.xlu1 %287  ;;  %v281_v2 = vpop.permute.xlu0 %280  ;;  %v300_v6 = vadd.f32 %v298_v61, %v296_v63 }
 0x1e4   :  { %v294_v3 = vsel %vm293_vm13, 0.0, %v288_v0  ;;  %v286_v4 = vsel %vm284_vm12, %v281_v2, 0.0 }
 0x1e5   :  { %v302_v8 = vmul.f32 %v2388_v62, %v294_v3  ;;  %v299_v9 = vmul.f32 %v2891_v1, %v286_v4 }
 0x1e7   :  { %v304_v10 = vadd.f32 %v302_v8, %v300_v6  ;;  %v290_v11 = vpop.permute.xlu1 %289  ;;  %v301_v19 = vadd.f32 %v299_v9, %v297_v12 }
 0x1e8   :  { %v295_v15 = vsel %vm293_vm13, 0.0, %v290_v11 }
 0x1e9   :  { %v350_v16 = vcombine.high %v304_v10, %v304_v10  ;;  %v357_v17 = vrot.slane %v304_v10, %v2833_v50  ;;  %v303_v18 = vmul.f32 %v2903_v37, %v295_v15 }
 0x1eb   :  { %v364_v21 = vrot.slane %v350_v16, %v2833_v50  ;;  %v365_v22 = vcombine.high %v357_v17, %v357_v17  ;;  %v309_v44 = vpop.permute.xlu1 %308  ;;  %v479_v23 = vrot.slane %v357_v17, %v2908_v13  ;;  %v1271_v24 = vrot.slane %v357_v17, %v1270_v14 }
 0x1ec   :  { %v305_v25 = vadd.f32 %v303_v18, %v301_v19  ;;  %v315_v26 = vsel %vm314_vm14, %v309_v44, 0.0 }
 0x1ed   :  { %v366_v27 = vcombine.high %v364_v21, %v364_v21  ;;  %v483_v28 = vrot.slane %v365_v22, %v2908_v13  ;;  %v487_v29 = vrot.slane %v364_v21, %v2908_v13  ;;  %v1275_v30 = vrot.slane %v365_v22, %v1270_v14 }
 0x1ee   :  { %v1279_v31 = vrot.slane %v364_v21, %v1270_v14  ;;  %v367_v32 = vcombine.high %v305_v25, %v305_v25  ;;  %v374_v38 = vrot.slane %v305_v25, %v2833_v50  ;;  %v327_v33 = vmul.f32 %v2386_v56, %v315_v26 }
 0x1ef   :  { %v491_v34 = vrot.slane %v366_v27, %v2908_v13  ;;  %v509_v35 = vsel %vm508_vm4, %v483_v28, %v479_v23  ;;  %v1283_v36 = vrot.slane %v366_v27, %v1270_v14  ;;  %v1300_v39 = vsel %vm508_vm4, %v1275_v30, %v1271_v24  ;;  %v318_v40 = vpop.permute.xlu1 %317 }
 0x1f0   :  { %v381_v42 = vrot.slane %v367_v32, %v2833_v50  ;;  %v382_v43 = vcombine.high %v374_v38, %v374_v38  ;;  %v495_v46 = vrot.slane %v374_v38, %v2908_v13  ;;  %v1287_v48 = vrot.slane %v374_v38, %v1270_v14 }
 0x1f1   :  { %v329_v49 = vadd.f32 %v327_v33, %v325_v20  ;;  %v323_v52 = vsel %vm293_vm13, 0.0, %v318_v40  ;;  %v1301_v55 = vsel %vm510_vm5, %v1279_v31, %v1300_v39  ;;  %v511_v56 = vsel %vm510_vm5, %v487_v29, %v509_v35 }
 0x1f2   :  { %v331_v57 = vmul.f32 %v2388_v62, %v323_v52  ;;  %v383_v59 = vcombine.high %v381_v42, %v381_v42  ;;  %v1291_v60 = vrot.slane %v382_v43, %v1270_v14  ;;  %v1295_v61 = vrot.slane %v381_v42, %v1270_v14 }
 0x1f3   :  { %v311_v63 = vpop.permute.xlu1 %310  ;;  %v1302_v0 = vsel %vm512_vm6, %v1283_v36, %v1301_v55  ;;  %v499_v2 = vrot.slane %v382_v43, %v2908_v13  ;;  %v503_v3 = vrot.slane %v381_v42, %v2908_v13  ;;  %v513_v4 = vsel %vm512_vm6, %v491_v34, %v511_v56 }
 0x1f4   :  { %v2933_v6 = vadd.f32 %v331_v57, %v329_v49  ;;  %v316_v8 = vsel %vm314_vm14, %v311_v63, 0.0  ;;  %v1299_v9 = vrot.slane %v383_v59, %v1270_v14  ;;  %v1303_v10 = vsel %vm514_vm7, %v1287_v48, %v1302_v0 }
 0x1f5   :  { %v1304_v62 = vsel %vm516_vm8, %v1291_v60, %v1303_v10  ;;  %v507_v11 = vrot.slane %v383_v59, %v2908_v13  ;;  %v515_v12 = vsel %vm514_vm7, %v495_v46, %v513_v4  ;;  %v328_v14 = vmul.f32 %v2891_v1, %v316_v8 }
 0x1f6   :  { %v386_v15 = vcombine.high %v2933_v6, %v2933_v6  ;;  %v393_v16 = vrot.slane %v2933_v6, %v2833_v50  ;;  %v1305_v17 = vsel %vm518_vm9, %v1295_v61, %v1304_v62  ;;  %v517_v18 = vsel %vm516_vm8, %v499_v2, %v515_v12 }
 0x1f7   :  { %v2948_v19 = vsel %vm520_vm10, %v1299_v9, %v1305_v17  ;;  %v519_v20 = vsel %vm518_vm9, %v503_v3, %v517_v18  ;;  %v320_v21 = vpop.permute.xlu1 %319  ;;  %v326_v1 = vmul.f32 %v2897_v5, %v2821_v45 }
 0x1f8   :  { %v400_v22 = vrot.slane %v386_v15, %v2833_v50  ;;  %v401_v44 = vcombine.high %v393_v16, %v393_v16  ;;  %v527_v23 = vpack.c.bf16 %v393_v16, %v393_v16  ;;  %1308 = vrot.lane.b32.xlu0 %v2948_v19, %s2683_s2  ;;  %v2955_v24 = vsel %vm520_vm10, %v507_v11, %v519_v20 }
 0x1f9   :  { %523 = vrot.lane.b32.xlu1 %v2955_v24, %s2683_s2  ;;  %v324_v25 = vsel %vm293_vm13, 0.0, %v320_v21  ;;  %v330_v30 = vadd.f32 %v328_v14, %v326_v1 }
 0x1fa   :  { %v402_v26 = vcombine.high %v400_v22, %v400_v22  ;;  %v528_v27 = vpack.c.bf16 %v401_v44, %v401_v44  ;;  %v529_v28 = vpack.c.bf16 %v400_v22, %v400_v22  ;;  %v543_v29 = vunpack.c.l.b16 %v527_v23 }
 0x1fb   :  { %v332_v31 = vmul.f32 %v2903_v37, %v324_v25 }
 0x1fc   :  { %v530_v32 = vpack.c.bf16 %v402_v26, %v402_v26  ;;  %v544_v38 = vunpack.c.l.b16 %v528_v27  ;;  %v545_v33 = vunpack.c.l.b16 %v529_v28  ;;  %v1312_v34 = vrot.slane %v543_v29, 1 }
 0x1fd   :  { %v2963_v35 = vadd.f32 %v332_v31, %v330_v30 }
 0x1fe   :  { %v546_v36 = vunpack.c.l.b16 %v530_v32  ;;  %v551_v45 = vrot.slane %v544_v38, 7  ;;  %v553_v5 = vrot.slane %v545_v33, 6  ;;  %v1313_v39 = vsel %vm508_vm4, %v544_v38, %v1312_v34 }
 0x1ff   :  { %v1314_v40 = vrot.slane %v545_v33, 7  ;;  %v403_v42 = vcombine.high %v2963_v35, %v2963_v35  ;;  %v410_v43 = vrot.slane %v2963_v35, %v2833_v50 }
 0x200   :  { %v552_v37 = vsel %vm508_vm4, %v551_v45, %v543_v29  ;;  %v555_v52 = vrot.slane %v546_v36, 5  ;;  %v1316_v55 = vrot.slane %v546_v36, 6  ;;  %vm901_vm4 = vcmask 122944  }
 0x201   :  { %v417_v46 = vrot.slane %v403_v42, %v2833_v50  ;;  %v418_v48 = vcombine.high %v410_v43, %v410_v43  ;;  %v531_v49 = vpack.c.bf16 %v410_v43, %v410_v43  ;;  %v554_v56 = vsel %vm510_vm5, %v553_v5, %v552_v37 }
 0x202   :  { %v1315_v57 = vsel %vm510_vm5, %v1314_v40, %v1313_v39  ;;  %v556_v9 = vsel %vm512_vm6, %v555_v52, %v554_v56  ;;  %v473_v5 = vand.u32 127, %v354_v41  ;;  %v2685_v40 = vmov -1e+30  }
 0x203   :  { %v532_v59 = vpack.c.bf16 %v418_v48, %v418_v48  ;;  %v533_v60 = vpack.c.bf16 %v417_v46, %v417_v46  ;;  %v547_v61 = vunpack.c.l.b16 %v531_v49  ;;  %v419_v63 = vcombine.high %v417_v46, %v417_v46 }
 0x204   :  { %v1317_v10 = vsel %vm512_vm6, %v1316_v55, %v1315_v57  ;;  %vm474_vm1 = vcmp.le.s32.totalorder %v473_v5, %v2828_v47  ;;  %vm1144_vm5 = vcmask 188544   ;;  %vm1259_vm6 = vcmask 254144  }
 0x205   :  { %v548_v0 = vunpack.c.l.b16 %v532_v59  ;;  %v549_v2 = vunpack.c.l.b16 %v533_v60  ;;  %v557_v3 = vrot.slane %v547_v61, 4  ;;  %v1318_v4 = vrot.slane %v547_v61, 5 }
 0x206   :  { %v534_v8 = vpack.c.bf16 %v419_v63, %v419_v63  ;;  %v475_v42 = vsel %vm474_vm1, 0.0, %v2685_v40 }
 0x207   :  { %v559_v62 = vrot.slane %v548_v0, 3  ;;  %v1320_v11 = vrot.slane %v548_v0, 4  ;;  %v558_v12 = vsel %vm514_vm7, %v557_v3, %v556_v9  ;;  %v561_v15 = vrot.slane %v549_v2, 2 }
 0x208   :  { %v550_v16 = vunpack.c.l.b16 %v534_v8  ;;  %v1319_v17 = vsel %vm514_vm7, %v1318_v4, %v1317_v10  ;;  %v1322_v18 = vrot.slane %v549_v2, 3  ;;  %vm343_vm7 = vcmask 130048  }
 0x209   :  { %v560_v14 = vsel %vm516_vm8, %v559_v62, %v558_v12  ;;  %v1321_v20 = vsel %vm516_vm8, %v1320_v11, %v1319_v17 }
 0x20a   :  { %v562_v21 = vsel %vm518_vm9, %v561_v15, %v560_v14  ;;  %v563_v22 = vrot.slane %v550_v16, 1  ;;  %v1324_v44 = vrot.slane %v550_v16, 2  ;;  %v1323_v23 = vsel %vm518_vm9, %v1322_v18, %v1321_v20 }
 0x20c   :  { %v564_v1 = vsel %vm520_vm10, %v563_v22, %v562_v21  ;;  %v1325_v26 = vsel %vm520_vm10, %v1324_v44, %v1323_v23 }
 0x20d   :  { %v565_v25 = vpack.c.b16 %v564_v1, %v564_v1  ;;  %v1326_v28 = vpack.c.b16 %v1325_v26, %v1325_v26 }
 0x20f   :  { %913 = vrot.lane.b32.xlu1 %v565_v25, %s2683_s2  ;;  %v571_v27 = vsel %vm566_vm15, %v565_v25, 0 }
 0x210   :  { %2488 = vmatpush3.bf16.xpose.msra.mxu0 %v571_v27 }
 0x211   :  { %2499 = vmatprep.subr.bf16.mxu0 %v2677_v7 }
 0x213   :  { %1646 = vrot.lane.b32.xlu1 %v1326_v28, %s2683_s2 }
 0x26a   :  { %v1309_v31 = vpop.permute.xlu0 %1308 }
 0x26b   :  { %v524_v29 = vpop.permute.xlu1 %523  ;;  %v1311_v32 = vpack.c.bf16 %v1309_v31, %v2948_v19 }
 0x26c   :  { %v526_v30 = vpack.c.bf16 %v524_v29, %v2955_v24  ;;  %v1331_v24 = vsel %vm566_vm15, %v1326_v28, 0 }
 0x26e   :  { %911 = vrot.lane.b32.xlu0 %v526_v30, %s2684_s3  ;;  %2490 = vmatmul.mubr.msk.bf16.vlgmr.msra.gmra.mxu0 %vm566_vm15, %v526_v30 }
 0x26f   :  { %2501 = vmatprep.mubr.msk.bf16.mxu0 %vm2679_vm2, %v2677_v7 }
 0x272   :  { %1644 = vrot.lane.b32.xlu0 %v1311_v32, %s2684_s3 }
 0x281   :  { %v914_v38 = vpop.permute.xlu1 %913 }
 0x282   :  { %v919_v33 = vsel %vm566_vm15, %v914_v38, 0 }
 0x283   :  { %2500 = vmatpush3.bf16.xpose.msra.mxu0 %v919_v33 }
 0x284   :  { %2511 = vmatprep.subr.bf16.mxu0 %v2677_v7 }
 0x285   :  { %v1647_v36 = vpop.permute.xlu1 %1646 }
 0x286   :  { %v1652_v19 = vsel %vm566_vm15, %v1647_v36, 0 }
 0x2e0   :  { %v912_v34 = vpop.permute.xlu0 %911 }
 0x2e1   :  { %2502 = vmatmul.mubr.msk.bf16.vlgmr.msra.gmra.mxu0 %vm566_vm15, %v912_v34 }
 0x2e2   :  { %2512 = vmatpush3.bf16.xpose.msra.mxu0 %v1331_v24  ;;  %2513 = vmatprep.mubr.msk.bf16.mxu0 %vm2679_vm2, %v2677_v7 }
 0x2e3   :  { %2523 = vmatprep.subr.bf16.mxu0 %v2677_v7 }
 0x2e4   :  { %v1645_v45 = vpop.permute.xlu0 %1644 }
 0x2e9   :  { %2514 = vmatmul.mubr.msk.bf16.vlgmr.msra.gmra.mxu0 %vm566_vm15, %v1311_v32 }
 0x2ea   :  { %2524 = vmatpush3.bf16.xpose.msra.mxu0 %v1652_v19  ;;  %2525 = vmatprep.mubr.msk.bf16.mxu0 %vm2679_vm2, %v2677_v7 }
 0x2eb   :  { %2535 = vmatprep.subr.bf16.mxu0 %v2677_v7 }
 0x2f1   :  { %2526 = vmatmul.mubr.msk.bf16.vlgmr.msra.gmra.mxu0 %vm566_vm15, %v1645_v45 }
 0x2f2   :  { %2539 = vmatprep.mubr.msk.bf16.mxu0 %vm2679_vm2, %v2677_v7 }
 0x32e   :  { %v607_v39 = vpop.f32.mrf.mxu0 }
 0x32f   :  { %v614_v43 = vmul.f32 0.35355338, %v607_v39 }
 0x330   :  { %v2491_v37 = vpop.f32.mrf.mxu0 }
 0x331   :  { %v616_v46 = vadd.f32 %v614_v43, %v475_v42 }
 0x332   :  { %v610_v48 = vpop.f32.mrf.mxu0 }
 0x333   :  { %v615_v49 = vmul.f32 0.35355338, %v610_v48  ;;  %v618_v52 = vsel %vm566_vm15, %v616_v46, -inf }
 0x334   :  { %619 = vmax.xlane.f32.xlu1 %v618_v52  ;;  %v2492_v55 = vpop.f32.mrf.mxu0 }
 0x335   :  { %v617_v56 = vadd.f32 %v615_v49, %v475_v42 }
 0x337   :  { %v621_v57 = vsel %vm566_vm15, %v617_v56, -inf }
 0x338   :  { %622 = vmax.xlane.f32.xlu0 %v621_v57 }
 0x3a1   :  { %v955_v59 = vpop.f32.mrf.mxu0 }
 0x3a2   :  { %v962_v41 = vmul.f32 0.35355338, %v955_v59 }
 0x3a3   :  { %v2503_v60 = vpop.f32.mrf.mxu0 }
 0x3a4   :  { %v964_v61 = vadd.f32 %v962_v41, %v475_v42 }
 0x3a5   :  { %v958_v63 = vpop.f32.mrf.mxu0 }
 0x3a6   :  { %v963_v0 = vmul.f32 0.35355338, %v958_v63  ;;  %v966_v2 = vsel %vm566_vm15, %v964_v61, -inf }
 0x3a7   :  { %967 = vmax.xlane.f32.xlu0 %v966_v2  ;;  %v2504_v3 = vpop.f32.mrf.mxu0 }
 0x3a8   :  { %v965_v4 = vadd.f32 %v963_v0, %v475_v42 }
 0x3a9   :  { %v1367_v8 = vpop.f32.mrf.mxu0 }
 0x3aa   :  { %v1374_v9 = vmul.f32 0.35355338, %v1367_v8  ;;  %v969_v10 = vsel %vm566_vm15, %v965_v4, -inf }
 0x3ab   :  { %970 = vmax.xlane.f32.xlu1 %v969_v10  ;;  %v2515_v62 = vpop.f32.mrf.mxu0 }
 0x3ac   :  { %v1376_v11 = vadd.f32 %v1374_v9, %v475_v42 }
 0x3ad   :  { %v1370_v12 = vpop.f32.mrf.mxu0 }
 0x3ae   :  { %v1375_v15 = vmul.f32 0.35355338, %v1370_v12  ;;  %v1378_v16 = vsel %vm566_vm15, %v1376_v11, -inf }
 0x3af   :  { %1379 = vmax.xlane.f32.xlu0 %v1378_v16  ;;  %v2516_v17 = vpop.f32.mrf.mxu0 }
 0x3b0   :  { %v1377_v18 = vadd.f32 %v1375_v15, %v475_v42 }
 0x3b1   :  { %v1688_v14 = vpop.f32.mrf.mxu0 }
 0x3b2   :  { %v1695_v20 = vmul.f32 0.35355338, %v1688_v14  ;;  %v1381_v21 = vsel %vm566_vm15, %v1377_v18, -inf }
 0x3b3   :  { %1382 = vmax.xlane.f32.xlu1 %v1381_v21  ;;  %v2527_v22 = vpop.f32.mrf.mxu0 }
 0x3b4   :  { %v1697_v44 = vadd.f32 %v1695_v20, %v475_v42 }
 0x3b5   :  { %v1691_v23 = vpop.f32.mrf.mxu0 }
 0x3b6   :  { %v1696_v1 = vmul.f32 0.35355338, %v1691_v23  ;;  %v1699_v25 = vsel %vm566_vm15, %v1697_v44, -inf }
 0x3b7   :  { %1700 = vmax.xlane.f32.xlu0 %v1699_v25  ;;  %v2528_v26 = vpop.f32.mrf.mxu0 }
 0x3b8   :  { %v1698_v27 = vadd.f32 %v1696_v1, %v475_v42 }
 0x3ba   :  { %v1702_v28 = vsel %vm566_vm15, %v1698_v27, -inf }
 0x3bb   :  { %1703 = vmax.xlane.f32.xlu1 %v1702_v28 }
 0x3bd   :  { %v620_v29 = vpop.xlane.xlu1 %619 }
 0x3be   :  { %v624_v30 = vsub.f32 %v616_v46, %v620_v29 }
 0x3c0   :  { %v626_v31 = vmul.f32 1.442695, %v624_v30 }
 0x3c1   :  { %v623_v32 = vpop.xlane.xlu0 %622 }
 0x3c2   :  { %2609 = vpow2.f32 %v626_v31  ;;  %v625_v38 = vsub.f32 %v617_v56, %v623_v32 }
 0x3c4   :  { %v628_v33 = vmul.f32 1.442695, %v625_v38 }
 0x3c6   :  { %2611 = vpow2.f32 %v628_v33 }
 0x3cf   :  { %v2610_v34 = vpop.eup %2609 }
 0x3d0   :  { %v630_v24 = vsel %vm566_vm15, %v2610_v34, 0.0 }
 0x3d1   :  { %631 = vadd.xlane.f32.xlu0 %v630_v24 }
 0x3d3   :  { %v2612_v36 = vpop.eup %2611 }
 0x3d4   :  { %v633_v19 = vsel %vm566_vm15, %v2612_v36, 0.0 }
 0x3d5   :  { %634 = vadd.xlane.f32.xlu1 %v633_v19 }
 0x430   :  { %v968_v45 = vpop.xlane.xlu0 %967 }
 0x431   :  { %v972_v5 = vsub.f32 %v964_v61, %v968_v45 }
 0x433   :  { %v974_v39 = vmul.f32 1.442695, %v972_v5 }
 0x434   :  { %v971_v40 = vpop.xlane.xlu1 %970 }
 0x435   :  { %2613 = vpow2.f32 %v974_v39  ;;  %v973_v42 = vsub.f32 %v965_v4, %v971_v40 }
 0x437   :  { %v976_v43 = vmul.f32 1.442695, %v973_v42 }
 0x438   :  { %v1380_v37 = vpop.xlane.xlu0 %1379 }
 0x439   :  { %2615 = vpow2.f32 %v976_v43  ;;  %v1384_v46 = vsub.f32 %v1376_v11, %v1380_v37 }
 0x43b   :  { %v1386_v48 = vmul.f32 1.442695, %v1384_v46 }
 0x43c   :  { %v1383_v49 = vpop.xlane.xlu1 %1382 }
 0x43d   :  { %2617 = vpow2.f32 %v1386_v48  ;;  %v1385_v52 = vsub.f32 %v1377_v18, %v1383_v49  ;;  %v1415_v18 = vpack.c.b16 %v2871_v53, %v2871_v53  ;;  %v2686_v48 = vmov 1966171168  }
 0x43e   :  { %v731_v49 = vunpack.c.l.s4 %v2686_v48 }
 0x43f   :  { %v1388_v55 = vmul.f32 1.442695, %v1385_v52 }
 0x440   :  { %v1701_v56 = vpop.xlane.xlu0 %1700  ;;  %v732_v52 = vunpack.c.0.s8 %v731_v49 }
 0x441   :  { %2619 = vpow2.f32 %v1388_v55  ;;  %v1705_v57 = vsub.f32 %v1697_v44, %v1701_v56 }
 0x442   :  { %v2614_v59 = vpop.eup %2613  ;;  %v3050_v55 = vsub.s32 %v732_v52, %v2828_v47 }
 0x443   :  { %v1707_v41 = vmul.f32 1.442695, %v1705_v57  ;;  %v978_v60 = vsel %vm566_vm15, %v2614_v59, 0.0 }
 0x444   :  { %979 = vadd.xlane.f32.xlu0 %v978_v60  ;;  %v1704_v61 = vpop.xlane.xlu1 %1703 }
 0x445   :  { %2621 = vpow2.f32 %v1707_v41  ;;  %v1706_v63 = vsub.f32 %v1698_v27, %v1704_v61 }
 0x446   :  { %v2616_v0 = vpop.eup %2615 }
 0x447   :  { %v1709_v2 = vmul.f32 1.442695, %v1706_v63  ;;  %v981_v3 = vsel %vm566_vm15, %v2616_v0, 0.0 }
 0x448   :  { %982 = vadd.xlane.f32.xlu1 %v981_v3 }
 0x449   :  { %2623 = vpow2.f32 %v1709_v2 }
 0x44a   :  { %v2618_v4 = vpop.eup %2617 }
 0x44b   :  { %v1390_v8 = vsel %vm566_vm15, %v2618_v4, 0.0 }
 0x44c   :  { %1391 = vadd.xlane.f32.xlu0 %v1390_v8 }
 0x44e   :  { %v2620_v9 = vpop.eup %2619 }
 0x44f   :  { %v1393_v10 = vsel %vm566_vm15, %v2620_v9, 0.0 }
 0x450   :  { %1394 = vadd.xlane.f32.xlu1 %v1393_v10 }
 0x452   :  { %v2622_v62 = vpop.eup %2621 }
 0x453   :  { %v1711_v11 = vsel %vm566_vm15, %v2622_v62, 0.0 }
 0x454   :  { %1712 = vadd.xlane.f32.xlu0 %v1711_v11 }
 0x456   :  { %v2624_v12 = vpop.eup %2623 }
 0x457   :  { %v1714_v15 = vsel %vm566_vm15, %v2624_v12, 0.0 }
 0x458   :  { %1715 = vadd.xlane.f32.xlu1 %v1714_v15 }
 0x45a   :  { %v632_v16 = vpop.xlane.xlu0 %631 }
 0x45b   :  { %2625 = vrcp.f32 %v632_v16 }
 0x45e   :  { %v635_v17 = vpop.xlane.xlu1 %634 }
 0x45f   :  { %2627 = vrcp.f32 %v635_v17 }
 0x468   :  { %v2626_v14 = vpop.eup %2625 }
 0x469   :  { %1722 = vrot.lane.b32.xlu1 %v1415_v18, %s2683_s2  ;;  %v637_v21 = vmul.f32 %v2626_v14, %v2610_v34  ;;  %v1420_v34 = vsel %vm683_vm11, %v1415_v18, 0 }
 0x46a   :  { %989 = vrot.lane.b32.xlu0 %v2873_v54, %s2683_s2 }
 0x46c   :  { %v2628_v20 = vpop.eup %2627 }
 0x46d   :  { %v639_v22 = vmul.f32 %v2628_v20, %v2612_v36 }
 0x46f   :  { %v640_v44 = vpack.c.bf16 %v639_v22, %v637_v21 }
 0x471   :  { %2496 = vmatmul.mubr.msk.bf16.vlgmr.msra.gmra.mxu1 %vm566_vm15, %v640_v44 }
 0x472   :  { %2507 = vmatprep.mubr.msk.bf16.mxu1 %vm2679_vm2, %v2677_v7 }
 0x4cd   :  { %v980_v23 = vpop.xlane.xlu0 %979 }
 0x4ce   :  { %2629 = vrcp.f32 %v980_v23 }
 0x4d1   :  { %v983_v1 = vpop.xlane.xlu1 %982 }
 0x4d2   :  { %2631 = vrcp.f32 %v983_v1 }
 0x4d5   :  { %v1392_v53 = vpop.xlane.xlu0 %1391 }
 0x4d6   :  { %2633 = vrcp.f32 %v1392_v53 }
 0x4d9   :  { %v1395_v25 = vpop.xlane.xlu1 %1394 }
 0x4da   :  { %2635 = vrcp.f32 %v1395_v25 }
 0x4db   :  { %v2630_v27 = vpop.eup %2629 }
 0x4dc   :  { %v985_v32 = vmul.f32 %v2630_v27, %v2614_v59 }
 0x4dd   :  { %v1713_v26 = vpop.xlane.xlu0 %1712 }
 0x4de   :  { %2637 = vrcp.f32 %v1713_v26 }
 0x4df   :  { %v2632_v54 = vpop.eup %2631 }
 0x4e0   :  { %v987_v28 = vmul.f32 %v2632_v54, %v2616_v0 }
 0x4e1   :  { %v990_v29 = vpop.permute.xlu0 %989  ;;  %v1716_v30 = vpop.xlane.xlu1 %1715 }
 0x4e2   :  { %v995_v31 = vsel %vm683_vm11, %v990_v29, 0  ;;  %2639 = vrcp.f32 %v1716_v30  ;;  %v988_v38 = vpack.c.bf16 %v987_v28, %v985_v32 }
 0x4e3   :  { %2506 = vmatpush3.bf16.msra.mxu1 %v995_v31  ;;  %v2634_v33 = vpop.eup %2633 }
 0x4e4   :  { %2517 = vmatprep.subr.bf16.mxu1 %v2677_v7  ;;  %v1397_v19 = vmul.f32 %v2634_v33, %v2618_v4 }
 0x4e5   :  { %v1723_v45 = vpop.permute.xlu1 %1722 }
 0x4e6   :  { %2508 = vmatmul.mubr.msk.bf16.vlgmr.msra.gmra.mxu1 %vm566_vm15, %v988_v38  ;;  %v1728_v40 = vsel %vm683_vm11, %v1723_v45, 0 }
 0x4e7   :  { %v2636_v24 = vpop.eup %2635  ;;  %2518 = vmatpush3.bf16.msra.mxu1 %v1420_v34  ;;  %2519 = vmatprep.mubr.msk.bf16.mxu1 %vm2679_vm2, %v2677_v7 }
 0x4e8   :  { %2529 = vmatprep.subr.bf16.mxu1 %v2677_v7  ;;  %v1399_v36 = vmul.f32 %v2636_v24, %v2620_v9 }
 0x4ea   :  { %v1400_v5 = vpack.c.bf16 %v1399_v36, %v1397_v19 }
 0x4eb   :  { %v2638_v39 = vpop.eup %2637 }
 0x4ec   :  { %v1718_v37 = vmul.f32 %v2638_v39, %v2622_v62 }
 0x4ee   :  { %2520 = vmatmul.mubr.msk.bf16.vlgmr.msra.gmra.mxu1 %vm566_vm15, %v1400_v5 }
 0x4ef   :  { %v2640_v42 = vpop.eup %2639  ;;  %2530 = vmatpush3.bf16.msra.mxu1 %v1728_v40  ;;  %2531 = vmatprep.mubr.msk.bf16.mxu1 %vm2679_vm2, %v2677_v7 }
 0x4f0   :  { %v1720_v43 = vmul.f32 %v2640_v42, %v2624_v12  ;;  %2543 = vmatprep.subr.bf16.mxu1 %v2677_v7 }
 0x4f2   :  { %v1721_v46 = vpack.c.bf16 %v1720_v43, %v1718_v37 }
 0x4f6   :  { %2532 = vmatmul.mubr.msk.bf16.vlgmr.msra.gmra.mxu1 %vm566_vm15, %v1721_v46 }
 0x4f7   :  { %2547 = vmatprep.mubr.msk.bf16.mxu1 %vm2679_vm2, %v2677_v7 }
 0x531   :  { %v721_v56 = vpop.f32.mrf.mxu1 }
 0x532   :  { %v729_v57 = vcombine.high %v721_v56, %v721_v56  ;;  %v736_v59 = vrot.slane %v721_v56, %v3050_v55 }
 0x533   :  { %v2497_v41 = vpop.f32.mrf.mxu1 }
 0x534   :  { %v743_v60 = vrot.slane %v729_v57, %v3050_v55  ;;  %v744_v61 = vcombine.high %v736_v59, %v736_v59  ;;  %v752_v63 = vrot.slane %v736_v59, %v3050_v55 }
 0x535   :  { %v724_v0 = vpop.f32.mrf.mxu1 }
 0x536   :  { %v745_v2 = vcombine.high %v743_v60, %v743_v60  ;;  %v759_v3 = vrot.slane %v743_v60, %v3050_v55  ;;  %v766_v4 = vrot.slane %v744_v61, %v3050_v55  ;;  %v774_v8 = vcombine.high %v752_v63, %v752_v63  ;;  %787 = vst.msk [vmem:[#allocation2] sm:$0x1] %vm786_vm3, %v752_v63 }
 0x537   :  { %v796_v47 = vcombine.high %v724_v0, %v724_v0  ;;  %v803_v9 = vrot.slane %v724_v0, %v3050_v55  ;;  %v2498_v10 = vpop.f32.mrf.mxu1 }
 0x538   :  { %788 = vst.msk [vmem:[#allocation2 + $0x2] sm:$0x1] %vm786_vm3, %v766_v4  ;;  %789 = vst.msk [vmem:[#allocation2 + $0x4] sm:$0x1] %vm786_vm3, %v774_v8  ;;  %v776_v62 = vcombine.high %v766_v4, %v766_v4  ;;  %v773_v11 = vrot.slane %v745_v2, %v3050_v55  ;;  %v775_v12 = vcombine.high %v759_v3, %v759_v3 }
 0x539   :  { %791 = vst.msk [vmem:[#allocation2 + $0x8] sm:$0x1] %vm786_vm3, %v759_v3  ;;  %v810_v15 = vrot.slane %v796_v47, %v3050_v55  ;;  %v811_v16 = vcombine.high %v803_v9, %v803_v9  ;;  %v819_v17 = vrot.slane %v803_v9, %v3050_v55 }
 0x53a   :  { %790 = vst.msk [vmem:[#allocation2 + $0x6] sm:$0x1] %vm786_vm3, %v776_v62  ;;  %792 = vst.msk [vmem:[#allocation2 + $0xa] sm:$0x1] %vm786_vm3, %v773_v11  ;;  %v777_v18 = vcombine.high %v773_v11, %v773_v11 }
 0x53b   :  { %793 = vst.msk [vmem:[#allocation2 + $0xc] sm:$0x1] %vm786_vm3, %v775_v12  ;;  %v833_v14 = vrot.slane %v811_v16, %v3050_v55  ;;  %v841_v20 = vcombine.high %v819_v17, %v819_v17  ;;  %v848_v21 = vrot.slane %v819_v17, %v2908_v13  ;;  %v812_v22 = vcombine.high %v810_v15, %v810_v15 }
 0x53c   :  { %794 = vst.msk [vmem:[#allocation2 + $0xe] sm:$0x1] %vm786_vm3, %v777_v18  ;;  %v826_v1 = vrot.slane %v810_v15, %v3050_v55 }
 0x53d   :  { %v852_v44 = vrot.slane %v833_v14, %v2908_v13  ;;  %v843_v23 = vcombine.high %v833_v14, %v833_v14  ;;  %877 = vrot.lane.b32.xlu1 %v848_v21, %s2687_s4  ;;  %v856_v53 = vrot.slane %v841_v20, %v2908_v13  ;;  %v840_v26 = vrot.slane %v812_v22, %v3050_v55 }
 0x53e   :  { %v864_v27 = vrot.slane %v826_v1, %v2908_v13  ;;  %v842_v54 = vcombine.high %v826_v1, %v826_v1 }
 0x53f   :  { %879 = vrot.lane.b32.xlu0 %v852_v44, %s2687_s4  ;;  %v860_v25 = vrot.slane %v843_v23, %v2908_v13  ;;  %v868_v28 = vrot.slane %v840_v26, %v2908_v13  ;;  %v844_v29 = vcombine.high %v840_v26, %v840_v26 }
 0x540   :  { %v872_v30 = vrot.slane %v842_v54, %v2908_v13 }
 0x541   :  { %881 = vrot.lane.b32.xlu1 %v856_v53, %s2687_s4  ;;  %v876_v31 = vrot.slane %v844_v29, %v2908_v13 }
 0x543   :  { %883 = vrot.lane.b32.xlu0 %v860_v25, %s2687_s4 }
 0x545   :  { %885 = vrot.lane.b32.xlu1 %v864_v27, %s2687_s4 }
 0x547   :  { %887 = vrot.lane.b32.xlu0 %v868_v28, %s2687_s4 }
 0x549   :  { %889 = vrot.lane.b32.xlu1 %v872_v30, %s2687_s4 }
 0x54b   :  { %891 = vrot.lane.b32.xlu0 %v876_v31, %s2687_s4 }
 0x5a6   :  { %v1031_v32 = vpop.f32.mrf.mxu1 }
 0x5a7   :  { %v1039_v38 = vcombine.high %v1031_v32, %v1031_v32  ;;  %v1046_v33 = vrot.slane %v1031_v32, %v3050_v55 }
 0x5a8   :  { %v2509_v34 = vpop.f32.mrf.mxu1 }
 0x5a9   :  { %v1053_v24 = vrot.slane %v1039_v38, %v3050_v55  ;;  %v1054_v36 = vcombine.high %v1046_v33, %v1046_v33  ;;  %v1062_v19 = vrot.slane %v1046_v33, %v3050_v55 }
 0x5aa   :  { %v1034_v45 = vpop.f32.mrf.mxu1 }
 0x5ab   :  { %v1076_v5 = vrot.slane %v1054_v36, %v3050_v55  ;;  %v1055_v39 = vcombine.high %v1053_v24, %v1053_v24  ;;  %v1084_v40 = vcombine.high %v1062_v19, %v1062_v19  ;;  %v1091_v43 = vrot.slane %v1062_v19, %v2908_v13 }
 0x5ac   :  { %v2510_v42 = vpop.f32.mrf.mxu1  ;;  %v1069_v56 = vrot.slane %v1053_v24, %v3050_v55  ;;  %v1161_v57 = vrot.slane %v1034_v45, %v3050_v55  ;;  %v1154_v16 = vcombine.high %v1034_v45, %v1034_v45 }
 0x5ad   :  { %v1095_v37 = vrot.slane %v1076_v5, %v2908_v13  ;;  %v1086_v46 = vcombine.high %v1076_v5, %v1076_v5  ;;  %1120 = vrot.lane.b32.xlu1 %v1091_v43, %s2688_s14  ;;  %v1099_v60 = vrot.slane %v1084_v40, %v2908_v13  ;;  %v1083_v61 = vrot.slane %v1055_v39, %v3050_v55 }
 0x5ae   :  { %v1456_v48 = vpop.f32.mrf.mxu1  ;;  %v1107_v12 = vrot.slane %v1069_v56, %v2908_v13  ;;  %v1085_v15 = vcombine.high %v1069_v56, %v1069_v56  ;;  %v1169_v17 = vcombine.high %v1161_v57, %v1161_v57  ;;  %v1177_v22 = vrot.slane %v1161_v57, %v3050_v55 }
 0x5af   :  { %v1464_v49 = vcombine.high %v1456_v48, %v1456_v48  ;;  %v1471_v52 = vrot.slane %v1456_v48, %v3050_v55  ;;  %1122 = vrot.lane.b32.xlu0 %v1095_v37, %s2688_s14  ;;  %v878_v59 = vpop.permute.xlu1 %877  ;;  %v1103_v4 = vrot.slane %v1086_v46, %v2908_v13  ;;  %v1111_v14 = vrot.slane %v1083_v61, %v2908_v13 }
 0x5b0   :  { %v2521_v41 = vpop.f32.mrf.mxu1  ;;  %902 = vst.msk [vmem:[#allocation2] sm:$0x1] %vm901_vm4, %v878_v59  ;;  %v1087_v20 = vcombine.high %v1083_v61, %v1083_v61  ;;  %v1115_v1 = vrot.slane %v1085_v15, %v2908_v13  ;;  %v1168_v53 = vrot.slane %v1154_v16, %v3050_v55  ;;  %v1191_v25 = vrot.slane %v1169_v17, %v3050_v55 }
 0x5b1   :  { %v3102_v63 = vrot.slane %v1464_v49, %v3050_v55  ;;  %v1479_v0 = vcombine.high %v1471_v52, %v1471_v52  ;;  %v1487_v2 = vrot.slane %v1471_v52, %v3050_v55  ;;  %v880_v3 = vpop.permute.xlu0 %879  ;;  %1124 = vrot.lane.b32.xlu1 %v1099_v60, %s2688_s14  ;;  %v1199_v28 = vcombine.high %v1177_v22, %v1177_v22 }
 0x5b2   :  { %903 = vst.msk [vmem:[#allocation2 + $0x2] sm:$0x1] %vm901_vm4, %v880_v3  ;;  %v3109_v8 = vpop.f32.mrf.mxu1  ;;  %v1119_v27 = vrot.slane %v1087_v20, %v2908_v13  ;;  %v1206_v31 = vrot.slane %v1177_v22, %v2908_v13  ;;  %v1170_v32 = vcombine.high %v1168_v53, %v1168_v53  ;;  %v1210_v33 = vrot.slane %v1191_v25, %v2908_v13 }
 0x5b3   :  { %v3113_v47 = vrot.slane %v3102_v63, %v3050_v55  ;;  %v3116_v9 = vrot.slane %v1479_v0, %v3050_v55  ;;  %v1509_v10 = vcombine.high %v1487_v2, %v1487_v2  ;;  %1521 = vst.msk [vmem:[#allocation2 + $0x1] sm:$0x1] %vm786_vm3, %v1487_v2  ;;  %1126 = vrot.lane.b32.xlu0 %v1103_v4, %s2688_s14  ;;  %v882_v62 = vpop.permute.xlu1 %881 }
 0x5b4   :  { %v2522_v11 = vpop.f32.mrf.mxu1  ;;  %904 = vst.msk [vmem:[#allocation2 + $0x4] sm:$0x1] %vm901_vm4, %v882_v62  ;;  %v1201_v34 = vcombine.high %v1191_v25, %v1191_v25  ;;  %v1184_v24 = vrot.slane %v1168_v53, %v3050_v55  ;;  %v1537_v36 = vrot.slane %v3109_v8, %v3050_v55  ;;  %v1214_v19 = vrot.slane %v1199_v28, %v2908_v13 }
 0x5b5   :  { %1522 = vst.msk [vmem:[#allocation2 + $0x3] sm:$0x1] %vm786_vm3, %v3116_v9  ;;  %1523 = vst.msk [vmem:[#allocation2 + $0x5] sm:$0x1] %vm786_vm3, %v1509_v10  ;;  %v884_v18 = vpop.permute.xlu0 %883  ;;  %1128 = vrot.lane.b32.xlu1 %v1107_v12, %s2688_s14  ;;  %v1480_v45 = vcombine.high %v3102_v63, %v3102_v63  ;;  %v1198_v39 = vrot.slane %v1170_v32, %v3050_v55  ;;  %v1530_v40 = vcombine.high %v3109_v8, %v3109_v8 }
 0x5b6   :  { %1525 = vst.msk [vmem:[#allocation2 + $0x9] sm:$0x1] %vm786_vm3, %v3113_v47  ;;  %v3130_v21 = vpop.f32.mrf.mxu1  ;;  %v1218_v5 = vrot.slane %v1201_v34, %v2908_v13  ;;  %v1545_v42 = vcombine.high %v1537_v36, %v1537_v36  ;;  %v1222_v43 = vrot.slane %v1184_v24, %v2908_v13  ;;  %v1200_v37 = vcombine.high %v1184_v24, %v1184_v24 }
 0x5b7   :  { %905 = vst.msk [vmem:[#allocation2 + $0x6] sm:$0x1] %vm901_vm4, %v884_v18  ;;  %1130 = vrot.lane.b32.xlu0 %v1111_v14, %s2688_s14  ;;  %v886_v44 = vpop.permute.xlu1 %885  ;;  %v1226_v46 = vrot.slane %v1198_v39, %v2908_v13  ;;  %v1202_v48 = vcombine.high %v1198_v39, %v1198_v39  ;;  %v1511_v49 = vcombine.high %v3116_v9, %v3116_v9 }
 0x5b8   :  { %v2533_v23 = vpop.f32.mrf.mxu1  ;;  %906 = vst.msk [vmem:[#allocation2 + $0x8] sm:$0x1] %vm901_vm4, %v886_v44  ;;  %v1508_v52 = vrot.slane %v1480_v45, %v3050_v55  ;;  %v1510_v56 = vcombine.high %v3113_v47, %v3113_v47  ;;  %v1553_v59 = vrot.slane %v1537_v36, %v3050_v55  ;;  %v1230_v41 = vrot.slane %v1200_v37, %v2908_v13 }
 0x5b9   :  { %v888_v26 = vpop.permute.xlu0 %887  ;;  %1132 = vrot.lane.b32.xlu1 %v1115_v1, %s2688_s14  ;;  %1524 = vst.msk [vmem:[#allocation2 + $0x7] sm:$0x1] %vm786_vm3, %v1511_v49  ;;  %v1544_v60 = vrot.slane %v1530_v40, %v3050_v55  ;;  %v1567_v61 = vrot.slane %v1545_v42, %v3050_v55  ;;  %v1234_v63 = vrot.slane %v1202_v48, %v2908_v13  ;;  %v2595_v49 = vld [vmem:[%s3388_s6 + $0x8] sm:$0xff]  }
 0x5ba   :  { %907 = vst.msk [vmem:[#allocation2 + $0xa] sm:$0x1] %vm901_vm4, %v888_v26  ;;  %v3141_v54 = vpop.f32.mrf.mxu1  ;;  %v1512_v57 = vcombine.high %v1508_v52, %v1508_v52  ;;  %v1575_v0 = vcombine.high %v1553_v59, %v1553_v59  ;;  %v1582_v2 = vrot.slane %v1553_v59, %v2908_v13  ;;  %v1779_v10 = vrot.slane %v3130_v21, %v3050_v55 }
 0x5bb   :  { %1134 = vrot.lane.b32.xlu0 %v1119_v27, %s2688_s14  ;;  %v890_v29 = vpop.permute.xlu1 %889  ;;  %1526 = vst.msk [vmem:[#allocation2 + $0xb] sm:$0x1] %vm786_vm3, %v1508_v52  ;;  %1527 = vst.msk [vmem:[#allocation2 + $0xd] sm:$0x1] %vm786_vm3, %v1510_v56  ;;  %v1546_v3 = vcombine.high %v1544_v60, %v1544_v60  ;;  %v1586_v4 = vrot.slane %v1567_v61, %v2908_v13  ;;  %v1577_v8 = vcombine.high %v1567_v61, %v1567_v61 }
 0x5bc   :  { %v2534_v30 = vpop.f32.mrf.mxu1  ;;  %908 = vst.msk [vmem:[#allocation2 + $0xc] sm:$0x1] %vm901_vm4, %v890_v29  ;;  %v1560_v47 = vrot.slane %v1544_v60, %v3050_v55  ;;  %v1590_v9 = vrot.slane %v1575_v0, %v2908_v13  ;;  %v1772_v16 = vcombine.high %v3130_v21, %v3130_v21  ;;  %v1787_v17 = vcombine.high %v1779_v10, %v1779_v10 }
 0x5bd   :  { %v892_v38 = vpop.permute.xlu0 %891  ;;  %1235 = vrot.lane.b32.xlu1 %v1206_v31, %s2689_s15  ;;  %1528 = vst.msk [vmem:[#allocation2 + $0xf] sm:$0x1] %vm786_vm3, %v1512_v57  ;;  %v1594_v62 = vrot.slane %v1577_v8, %v2908_v13  ;;  %v1574_v11 = vrot.slane %v1546_v3, %v3050_v55  ;;  %v1795_v20 = vrot.slane %v1779_v10, %v3050_v55  ;;  %v2596_v57 = vld [vmem:[%s3388_s6] sm:$0xff]  }
 0x5be   :  { %909 = vst.msk [vmem:[#allocation2 + $0xe] sm:$0x1] %vm901_vm4, %v892_v38  ;;  %v1598_v12 = vrot.slane %v1560_v47, %v2908_v13  ;;  %v1576_v15 = vcombine.high %v1560_v47, %v1560_v47  ;;  %v1786_v44 = vrot.slane %v1772_v16, %v3050_v55  ;;  %v1809_v23 = vrot.slane %v1787_v17, %v3050_v55 }
 0x5bf   :  { %1237 = vrot.lane.b32.xlu0 %v1210_v33, %s2689_s15  ;;  %v1602_v18 = vrot.slane %v1574_v11, %v2908_v13  ;;  %v1578_v14 = vcombine.high %v1574_v11, %v1574_v11  ;;  %v1817_v21 = vcombine.high %v1795_v20, %v1795_v20  ;;  %v1824_v53 = vrot.slane %v1795_v20, %v2908_v13 }
 0x5c0   :  { %v1606_v22 = vrot.slane %v1576_v15, %v2908_v13  ;;  %v1788_v25 = vcombine.high %v1786_v44, %v1786_v44  ;;  %v1828_v26 = vrot.slane %v1809_v23, %v2908_v13  ;;  %v1819_v27 = vcombine.high %v1809_v23, %v1809_v23  ;;  %2536 = vmatpush3.bf16.msra.mxu0 %v2595_v49 }
 0x5c1   :  { %1239 = vrot.lane.b32.xlu1 %v1214_v19, %s2689_s15  ;;  %v1610_v1 = vrot.slane %v1578_v14, %v2908_v13  ;;  %v1802_v28 = vrot.slane %v1786_v44, %v3050_v55  ;;  %v1832_v29 = vrot.slane %v1817_v21, %v2908_v13  ;;  %v1893_v30 = vrot.slane %v3141_v54, %v3050_v55 }
 0x5c2   :  { %v1836_v31 = vrot.slane %v1819_v27, %v2908_v13  ;;  %v1816_v32 = vrot.slane %v1788_v25, %v3050_v55  ;;  %v1886_v34 = vcombine.high %v3141_v54, %v3141_v54  ;;  %2537 = vmatprep.subr.bf16.mxu0 %v2677_v7 }
 0x5c3   :  { %1241 = vrot.lane.b32.xlu0 %v1218_v5, %s2689_s15  ;;  %v1840_v38 = vrot.slane %v1802_v28, %v2908_v13  ;;  %v1818_v33 = vcombine.high %v1802_v28, %v1802_v28  ;;  %v1901_v24 = vcombine.high %v1893_v30, %v1893_v30  ;;  %v1909_v45 = vrot.slane %v1893_v30, %v3050_v55 }
 0x5c4   :  { %v1844_v36 = vrot.slane %v1816_v32, %v2908_v13  ;;  %v1820_v19 = vcombine.high %v1816_v32, %v1816_v32  ;;  %v1900_v39 = vrot.slane %v1886_v34, %v3050_v55  ;;  %2538 = vmatpush3.bf16.msra.mxu0 %v2596_v57 }
 0x5c5   :  { %1243 = vrot.lane.b32.xlu1 %v1222_v43, %s2689_s15  ;;  %v1848_v5 = vrot.slane %v1818_v33, %v2908_v13  ;;  %v1923_v40 = vrot.slane %v1901_v24, %v3050_v55  ;;  %v1931_v54 = vcombine.high %v1909_v45, %v1909_v45  ;;  %v1938_v43 = vrot.slane %v1909_v45, %v2908_v13 }
 0x5c6   :  { %v1852_v42 = vrot.slane %v1820_v19, %v2908_v13  ;;  %v1902_v37 = vcombine.high %v1900_v39, %v1900_v39  ;;  %v1916_v52 = vrot.slane %v1900_v39, %v3050_v55  ;;  %2551 = vmatprep.subr.bf16.mxu0 %v2677_v7 }
 0x5c7   :  { %1245 = vrot.lane.b32.xlu0 %v1226_v46, %s2689_s15  ;;  %v1942_v46 = vrot.slane %v1923_v40, %v2908_v13  ;;  %v1933_v48 = vcombine.high %v1923_v40, %v1923_v40  ;;  %v1946_v56 = vrot.slane %v1931_v54, %v2908_v13 }
 0x5c8   :  { %v1954_v60 = vrot.slane %v1916_v52, %v2908_v13  ;;  %v1932_v61 = vcombine.high %v1916_v52, %v1916_v52 }
 0x5c9   :  { %1247 = vrot.lane.b32.xlu1 %v1230_v41, %s2689_s15  ;;  %v1950_v59 = vrot.slane %v1933_v48, %v2908_v13  ;;  %v1930_v41 = vrot.slane %v1902_v37, %v3050_v55 }
 0x5ca   :  { %v1962_v55 = vrot.slane %v1932_v61, %v2908_v13 }
 0x5cb   :  { %1249 = vrot.lane.b32.xlu0 %v1234_v63, %s2689_s15  ;;  %v1958_v63 = vrot.slane %v1930_v41, %v2908_v13  ;;  %v1934_v0 = vcombine.high %v1930_v41, %v1930_v41 }
 0x5cd   :  { %1611 = vrot.lane.b32.xlu1 %v1582_v2, %s2687_s4  ;;  %v1966_v2 = vrot.slane %v1934_v0, %v2908_v13 }
 0x5cf   :  { %1613 = vrot.lane.b32.xlu0 %v1586_v4, %s2687_s4 }
 0x5d1   :  { %1615 = vrot.lane.b32.xlu1 %v1590_v9, %s2687_s4 }
 0x5d3   :  { %1617 = vrot.lane.b32.xlu0 %v1594_v62, %s2687_s4 }
 0x5d5   :  { %1619 = vrot.lane.b32.xlu1 %v1598_v12, %s2687_s4 }
 0x5d7   :  { %1621 = vrot.lane.b32.xlu0 %v1602_v18, %s2687_s4 }
 0x5d9   :  { %1623 = vrot.lane.b32.xlu1 %v1606_v22, %s2687_s4 }
 0x5db   :  { %1625 = vrot.lane.b32.xlu0 %v1610_v1, %s2687_s4 }
 0x5dd   :  { %1853 = vrot.lane.b32.xlu1 %v1824_v53, %s2688_s14 }
 0x5df   :  { %1855 = vrot.lane.b32.xlu0 %v1828_v26, %s2688_s14 }
 0x5e1   :  { %1857 = vrot.lane.b32.xlu1 %v1832_v29, %s2688_s14 }
 0x5e3   :  { %1859 = vrot.lane.b32.xlu0 %v1836_v31, %s2688_s14 }
 0x5e5   :  { %1861 = vrot.lane.b32.xlu1 %v1840_v38, %s2688_s14 }
 0x5e7   :  { %1863 = vrot.lane.b32.xlu0 %v1844_v36, %s2688_s14 }
 0x5e9   :  { %1865 = vrot.lane.b32.xlu1 %v1848_v5, %s2688_s14 }
 0x5eb   :  { %1867 = vrot.lane.b32.xlu0 %v1852_v42, %s2688_s14 }
 0x5ed   :  { %1967 = vrot.lane.b32.xlu1 %v1938_v43, %s2689_s15 }
 0x5ef   :  { %1969 = vrot.lane.b32.xlu0 %v1942_v46, %s2689_s15 }
 0x5f1   :  { %1971 = vrot.lane.b32.xlu1 %v1946_v56, %s2689_s15 }
 0x5f3   :  { %1973 = vrot.lane.b32.xlu0 %v1950_v59, %s2689_s15 }
 0x5f5   :  { %1975 = vrot.lane.b32.xlu1 %v1954_v60, %s2689_s15 }
 0x5f7   :  { %1977 = vrot.lane.b32.xlu0 %v1958_v63, %s2689_s15 }
 0x5f9   :  { %1979 = vrot.lane.b32.xlu1 %v1962_v55, %s2689_s15 }
 0x5fb   :  { %1981 = vrot.lane.b32.xlu0 %v1966_v2, %s2689_s15 }
 0x61f   :  { %v1121_v3 = vpop.permute.xlu1 %1120 }
 0x620   :  { %1145 = vst.msk [vmem:[#allocation2] sm:$0x1] %vm1144_vm5, %v1121_v3 }
 0x621   :  { %v1123_v4 = vpop.permute.xlu0 %1122 }
 0x622   :  { %1146 = vst.msk [vmem:[#allocation2 + $0x2] sm:$0x1] %vm1144_vm5, %v1123_v4 }
 0x623   :  { %v1125_v8 = vpop.permute.xlu1 %1124 }
 0x624   :  { %1147 = vst.msk [vmem:[#allocation2 + $0x4] sm:$0x1] %vm1144_vm5, %v1125_v8  ;;  %v2653_v8 = vld [vmem:[%s3382_s0] sm:$0xff] }
 0x625   :  { %v1127_v47 = vpop.permute.xlu0 %1126 }
 0x626   :  { %1148 = vst.msk [vmem:[#allocation2 + $0x6] sm:$0x1] %vm1144_vm5, %v1127_v47 }
 0x627   :  { %v1129_v9 = vpop.permute.xlu1 %1128 }
 0x628   :  { %1149 = vst.msk [vmem:[#allocation2 + $0x8] sm:$0x1] %vm1144_vm5, %v1129_v9 }
 0x629   :  { %v1131_v13 = vpop.permute.xlu0 %1130 }
 0x62a   :  { %1150 = vst.msk [vmem:[#allocation2 + $0xa] sm:$0x1] %vm1144_vm5, %v1131_v13 }
 0x62b   :  { %v1133_v10 = vpop.permute.xlu1 %1132 }
 0x62c   :  { %1151 = vst.msk [vmem:[#allocation2 + $0xc] sm:$0x1] %vm1144_vm5, %v1133_v10  ;;  %v2654_v10 = vld [vmem:[%s3382_s0 + $0x8] sm:$0xff] }
 0x62d   :  { %v1135_v62 = vpop.permute.xlu0 %1134 }
 0x62e   :  { %1152 = vst.msk [vmem:[#allocation2 + $0xe] sm:$0x1] %vm1144_vm5, %v1135_v62 }
 0x62f   :  { %v1236_v11 = vpop.permute.xlu1 %1235 }
 0x630   :  { %1260 = vst.msk [vmem:[#allocation2] sm:$0x1] %vm1259_vm6, %v1236_v11 }
 0x631   :  { %v1238_v12 = vpop.permute.xlu0 %1237 }
 0x632   :  { %1261 = vst.msk [vmem:[#allocation2 + $0x2] sm:$0x1] %vm1259_vm6, %v1238_v12 }
 0x633   :  { %v1240_v15 = vpop.permute.xlu1 %1239 }
 0x634   :  { %1262 = vst.msk [vmem:[#allocation2 + $0x4] sm:$0x1] %vm1259_vm6, %v1240_v15 }
 0x635   :  { %v1242_v16 = vpop.permute.xlu0 %1241 }
 0x636   :  { %1263 = vst.msk [vmem:[#allocation2 + $0x6] sm:$0x1] %vm1259_vm6, %v1242_v16 }
 0x637   :  { %v1244_v17 = vpop.permute.xlu1 %1243 }
 0x638   :  { %1264 = vst.msk [vmem:[#allocation2 + $0x8] sm:$0x1] %vm1259_vm6, %v1244_v17  ;;  %v2597_v17 = vld [vmem:[%s3389_s7 + $0x8] sm:$0xff]  }
 0x639   :  { %v1246_v18 = vpop.permute.xlu0 %1245  ;;  %2544 = vmatpush3.bf16.msra.mxu1 %v2597_v17 }
 0x63a   :  { %1265 = vst.msk [vmem:[#allocation2 + $0xa] sm:$0x1] %vm1259_vm6, %v1246_v18  ;;  %v2598_v18 = vld [vmem:[%s3390_s8 + $0x8] sm:$0xff]   ;;  %2545 = vmatprep.subr.bf16.mxu1 %v2677_v7 }
 0x63b   :  { %v1248_v14 = vpop.permute.xlu1 %1247 }
 0x63c   :  { %1266 = vst.msk [vmem:[#allocation2 + $0xc] sm:$0x1] %vm1259_vm6, %v1248_v14  ;;  %v2599_v14 = vld [vmem:[%s3389_s7] sm:$0xff]  }
 0x63d   :  { %v1250_v20 = vpop.permute.xlu0 %1249  ;;  %2546 = vmatpush3.bf16.msra.mxu1 %v2599_v14 }
 0x63e   :  { %1267 = vst.msk [vmem:[#allocation2 + $0xe] sm:$0x1] %vm1259_vm6, %v1250_v20  ;;  %2559 = vmatprep.subr.bf16.mxu1 %v2677_v7 }
 0x63f   :  { %v1612_v22 = vpop.permute.xlu1 %1611 }
 0x640   :  { %1635 = vst.msk [vmem:[#allocation2 + $0x1] sm:$0x1] %vm901_vm4, %v1612_v22 }
 0x641   :  { %v1614_v44 = vpop.permute.xlu0 %1613 }
 0x642   :  { %1636 = vst.msk [vmem:[#allocation2 + $0x3] sm:$0x1] %vm901_vm4, %v1614_v44 }
 0x643   :  { %v1616_v23 = vpop.permute.xlu1 %1615 }
 0x644   :  { %1637 = vst.msk [vmem:[#allocation2 + $0x5] sm:$0x1] %vm901_vm4, %v1616_v23 }
 0x645   :  { %v1618_v1 = vpop.permute.xlu0 %1617 }
 0x646   :  { %1638 = vst.msk [vmem:[#allocation2 + $0x7] sm:$0x1] %vm901_vm4, %v1618_v1 }
 0x647   :  { %v1620_v21 = vpop.permute.xlu1 %1619 }
 0x648   :  { %1639 = vst.msk [vmem:[#allocation2 + $0x9] sm:$0x1] %vm901_vm4, %v1620_v21 }
 0x649   :  { %v1622_v53 = vpop.permute.xlu0 %1621 }
 0x64a   :  { %1640 = vst.msk [vmem:[#allocation2 + $0xb] sm:$0x1] %vm901_vm4, %v1622_v53 }
 0x64b   :  { %v1624_v25 = vpop.permute.xlu1 %1623 }
 0x64c   :  { %1641 = vst.msk [vmem:[#allocation2 + $0xd] sm:$0x1] %vm901_vm4, %v1624_v25 }
 0x64d   :  { %v1626_v26 = vpop.permute.xlu0 %1625 }
 0x64e   :  { %1642 = vst.msk [vmem:[#allocation2 + $0xf] sm:$0x1] %vm901_vm4, %v1626_v26 }
 0x64f   :  { %v1854_v27 = vpop.permute.xlu1 %1853 }
 0x650   :  { %1877 = vst.msk [vmem:[#allocation2 + $0x1] sm:$0x1] %vm1144_vm5, %v1854_v27 }
 0x651   :  { %v1856_v28 = vpop.permute.xlu0 %1855 }
 0x652   :  { %1878 = vst.msk [vmem:[#allocation2 + $0x3] sm:$0x1] %vm1144_vm5, %v1856_v28 }
 0x653   :  { %v1858_v29 = vpop.permute.xlu1 %1857 }
 0x654   :  { %1879 = vst.msk [vmem:[#allocation2 + $0x5] sm:$0x1] %vm1144_vm5, %v1858_v29  ;;  %v2401_v29 = vld [vmem:[%s3383_s1 + $0x1] ss:$0 sm:$0xff] }
 0x655   :  { %v1860_v30 = vpop.permute.xlu0 %1859 }
 0x656   :  { %1880 = vst.msk [vmem:[#allocation2 + $0x7] sm:$0x1] %vm1144_vm5, %v1860_v30 }
 0x657   :  { %v1862_v31 = vpop.permute.xlu1 %1861 }
 0x658   :  { %1881 = vst.msk [vmem:[#allocation2 + $0x9] sm:$0x1] %vm1144_vm5, %v1862_v31 }
 0x659   :  { %v1864_v32 = vpop.permute.xlu0 %1863 }
 0x65a   :  { %1882 = vst.msk [vmem:[#allocation2 + $0xb] sm:$0x1] %vm1144_vm5, %v1864_v32 }
 0x65b   :  { %v1866_v38 = vpop.permute.xlu1 %1865 }
 0x65c   :  { %1883 = vst.msk [vmem:[#allocation2 + $0xd] sm:$0x1] %vm1144_vm5, %v1866_v38 }
 0x65d   :  { %v1868_v33 = vpop.permute.xlu0 %1867 }
 0x65e   :  { %1884 = vst.msk [vmem:[#allocation2 + $0xf] sm:$0x1] %vm1144_vm5, %v1868_v33  ;;  %v2602_v33 = vld [vmem:[%s3391_s9 + $0x10] sm:$0xff]  }
 0x65f   :  { %v1968_v34 = vpop.permute.xlu1 %1967 }
 0x660   :  { %1991 = vst.msk [vmem:[#allocation2 + $0x1] sm:$0x1] %vm1259_vm6, %v1968_v34  ;;  %v2603_v34 = vld [vmem:[%s3391_s9 + $0x8] sm:$0xff]  }
 0x661   :  { %v1970_v24 = vpop.permute.xlu0 %1969 }
 0x662   :  { %1992 = vst.msk [vmem:[#allocation2 + $0x3] sm:$0x1] %vm1259_vm6, %v1970_v24  ;;  %v2604_v24 = vld [vmem:[%s3391_s9] sm:$0xff]  }
 0x663   :  { %v1972_v36 = vpop.permute.xlu1 %1971 }
 0x664   :  { %1993 = vst.msk [vmem:[#allocation2 + $0x5] sm:$0x1] %vm1259_vm6, %v1972_v36 }
 0x665   :  { %v1974_v19 = vpop.permute.xlu0 %1973 }
 0x666   :  { %1994 = vst.msk [vmem:[#allocation2 + $0x7] sm:$0x1] %vm1259_vm6, %v1974_v19 }
 0x667   :  { %v1976_v45 = vpop.permute.xlu1 %1975  ;;  %v1999_v48 = vld [vmem:[#allocation2] sm:$0x3] }
 0x668   :  { %1995 = vst.msk [vmem:[#allocation2 + $0x9] sm:$0x1] %vm1259_vm6, %v1976_v45 }
 0x669   :  { %v1978_v5 = vpop.permute.xlu0 %1977  ;;  %v2000_v54 = vld [vmem:[#allocation2 + $0x2] sm:$0x3] }
 0x66a   :  { %1996 = vst.msk [vmem:[#allocation2 + $0xb] sm:$0x1] %vm1259_vm6, %v1978_v5  ;;  %v2015_v52 = vcombine.low %v1999_v48, %v2000_v54 }
 0x66b   :  { %v1980_v39 = vpop.permute.xlu1 %1979  ;;  %v2001_v43 = vld [vmem:[#allocation2 + $0x4] sm:$0x3] }
 0x66c   :  { %1997 = vst.msk [vmem:[#allocation2 + $0xd] sm:$0x1] %vm1259_vm6, %v1980_v39  ;;  %v2023_v61 = vrot.slane %v2015_v52, %v2833_v50 }
 0x66d   :  { %v1982_v40 = vpop.permute.xlu0 %1981  ;;  %v2002_v42 = vld [vmem:[#allocation2 + $0x6] sm:$0x3] }
 0x66e   :  { %1998 = vst.msk [vmem:[#allocation2 + $0xf] sm:$0x1] %vm1259_vm6, %v1982_v40  ;;  %v2016_v46 = vcombine.low %v2001_v43, %v2002_v42 }
 0x66f   :  { %v2003_v49 = vld [vmem:[#allocation2 + $0x8] sm:$0x3] }
 0x670   :  { %v2030_v41 = vrot.slane %v2016_v46, %v2833_v50 }
 0x671   :  { %v2004_v37 = vld [vmem:[#allocation2 + $0xa] sm:$0x3] }
 0x672   :  { %v2032_v56 = vcombine.low %v2003_v49, %v2004_v37  ;;  %v2031_v55 = vcombine.low %v2023_v61, %v2030_v41 }
 0x673   :  { %v2005_v57 = vld [vmem:[#allocation2 + $0xc] sm:$0x3] }
 0x674   :  { %v2040_v63 = vrot.slane %v2032_v56, %v2833_v50 }
 0x675   :  { %v2006_v59 = vld [vmem:[#allocation2 + $0xe] sm:$0x3] }
 0x676   :  { %v2033_v60 = vcombine.low %v2005_v57, %v2006_v59 }
 0x678   :  { %v2047_v0 = vrot.slane %v2033_v60, %v2833_v50 }
 0x67a   :  { %v2048_v2 = vcombine.low %v2040_v63, %v2047_v0 }
 0x67c   :  { %v2051_v3 = vpack.c.bf16 %v2048_v2, %v2031_v55 }
 0x67e   :  { %2540 = vmatmul.mubr.msk.bf16.vlgmr.msra.gmra.mxu0 %vm43_vm0, %v2051_v3 }
 0x67f   :  { %2555 = vmatprep.mubr.msk.bf16.mxu0 %vm2679_vm2, %v2677_v7  ;;  %2552 = vmatpush3.bf16.msra.mxu0 %v2598_v18 }
 0x680   :  { %2553 = vmatprep.subr.bf16.mxu0 %v2677_v7 }
 0x73e   :  { %v2105_v4 = vpop.f32.mrf.mxu0 }
 0x73f   :  { %v3308_v47 = vadd.f32 %v2653_v8, %v2105_v4 }
 0x740   :  { %v2541_v9 = vpop.f32.mrf.mxu0 }
 0x741   :  { %v2114_v13 = vmul.f32 %v3308_v47, %v3308_v47 }
 0x742   :  { %v2108_v50 = vpop.f32.mrf.mxu0 }
 0x743   :  { %v3315_v62 = vadd.f32 %v2654_v10, %v2108_v50  ;;  %v2116_v11 = vsel %vm43_vm0, %v2114_v13, 0.0 }
 0x744   :  { %2117 = vadd.xlane.f32.xlu1 %v2116_v11  ;;  %v2542_v12 = vpop.f32.mrf.mxu0 }
 0x745   :  { %v2115_v15 = vmul.f32 %v3315_v62, %v3315_v62 }
 0x747   :  { %v2119_v16 = vsel %vm43_vm0, %v2115_v15, 0.0 }
 0x748   :  { %2120 = vadd.xlane.f32.xlu0 %v2119_v16 }
 0x755   :  { %339 = vrot.lane.b32.xlu1 %v2844_v58, %s2688_s14  ;;  %v2600_v58 = vld [vmem:[%s3390_s8] sm:$0xff]  }
 0x756   :  { %2554 = vmatpush3.bf16.msra.mxu0 %v2600_v58 }
 0x75e   :  { %337 = vrot.lane.b32.xlu0 %v2835_v51, %s2688_s14 }
 0x7cd   :  { %v2118_v51 = vpop.xlane.xlu1 %2117 }
 0x7ce   :  { %v2122_v20 = vmul.f32 0.03125, %v2118_v51 }
 0x7d0   :  { %v2125_v22 = vadd.f32 1e-05, %v2122_v20 }
 0x7d1   :  { %v340_v44 = vpop.permute.xlu1 %339  ;;  %v2121_v23 = vpop.xlane.xlu0 %2120 }
 0x7d2   :  { %2641 = vrsqrt.f32 %v2125_v22  ;;  %v345_v1 = vsel %vm343_vm7, %v2963_v35, %v340_v44  ;;  %v2123_v21 = vmul.f32 0.03125, %v2121_v23 }
 0x7d3   :  { %347 = vst.msk [vmem:[%s3393_s11 + $0x8] sm:$0xff] %vm43_vm0, %v345_v1 }
 0x7d4   :  { %v2126_v53 = vadd.f32 1e-05, %v2123_v21 }
 0x7d5   :  { %v338_v25 = vpop.permute.xlu0 %337 }
 0x7d6   :  { %2643 = vrsqrt.f32 %v2126_v53  ;;  %v344_v26 = vsel %vm343_vm7, %v2933_v6, %v338_v25  ;;  %v2601_v6 = vld [vmem:[%s3391_s9 + $0x18] sm:$0xff]   ;;  %s2690_s9 = smov [#allocation3]  }
 0x7d7   :  { %346 = vst.msk [vmem:[%s3393_s11] sm:$0xff] %vm43_vm0, %v344_v26  ;;  %s2358_s18 = sshll.u32 %s2690_s9, 4  ;;  %s2359_s18 = int_to_ptr.vmem [resolvable:$true] %s2358_s18 }
 0x7d8   :  { %s2655_s19 = scalar_lea.vmem %s2359_s18, 256  ;;  %p2660_p1 = scmp.lt.s32.totalorder %s2359_s18, %s2359_s18 }
 0x7d9   :  { %p2656_p0 = scmp.ne.s32.totalorder %s2359_s18, %s2655_s19  ;;  %p2661_p2 = scmp.lt.s32.totalorder %s2655_s19, %s2655_s19 }
 0x7db   :  { %p2662_p3 = por %p2661_p2, %p2660_p1 }
 0x7dd   :  { %p2663_p4 = pnand %p2662_p3, %p2656_p0 }
 0x7df   :  { %v2642_v27 = vpop.eup %2641 }
 0x7e0   :  { %v2129_v28 = vmul.f32 %v2642_v27, %v3308_v47 }
 0x7e2   :  { %v2135_v31 = vmul.f32 %v2401_v29, %v2129_v28 }
 0x7e3   :  { %v2644_v35 = vpop.eup %2643 }
 0x7e4   :  { %v2130_v30 = vmul.f32 %v2644_v35, %v3315_v62 }
 0x7e6   :  { %v2136_v32 = vmul.f32 %v2401_v29, %v2130_v30 }
 0x7e8   :  { %v2137_v38 = vpack.c.bf16 %v2136_v32, %v2135_v31 }
 0x7ea   :  { %2548 = vmatmul.mubr.msk.bf16.vlgmr.msra.gmra.mxu1 %vm43_vm0, %v2137_v38  ;;  %2556 = vmatmul.mubr.msk.bf16.vlgmr.msra.gmra.mxu0 %vm43_vm0, %v2137_v38 }
 0x7eb   :  { %2567 = vmatprep.mubr.msk.bf16.mxu1 %vm2679_vm2, %v2677_v7  ;;  %2560 = vmatpush3.bf16.msra.mxu1 %v2601_v6  ;;  %vm2304_vm2 = vcmask 523264  }
 0x7ec   :  { %2561 = vmatprep.subr.bf16.mxu1 %v2677_v7 }
 0x7ef   :  { %2562 = vmatpush3.bf16.msra.mxu1 %v2602_v33 }
 0x7f0   :  { %2563 = vmatprep.subr.bf16.mxu1 %v2677_v7 }
 0x7f3   :  { %2564 = vmatpush3.bf16.msra.mxu1 %v2603_v34 }
 0x7f4   :  { %2565 = vmatprep.subr.bf16.mxu1 %v2677_v7 }
 0x7f7   :  { %2566 = vmatpush3.bf16.msra.mxu1 %v2604_v24 }
 0x8aa   :  { %v2191_v36 = vpop.f32.mrf.mxu1  ;;  %v2248_v19 = vpop.f32.mrf.mxu0 }
 0x8ab   :  { %v2408_v45 = vmul.f32 -1.442695, %v2191_v36 }
 0x8ac   :  { %v2549_v5 = vpop.f32.mrf.mxu1  ;;  %v2557_v39 = vpop.f32.mrf.mxu0 }
 0x8ad   :  { %2645 = vpow2.f32 %v2408_v45 }
 0x8ae   :  { %v2194_v40 = vpop.f32.mrf.mxu1  ;;  %v2251_v42 = vpop.f32.mrf.mxu0 }
 0x8af   :  { %v2409_v54 = vmul.f32 -1.442695, %v2194_v40 }
 0x8b0   :  { %v2550_v43 = vpop.f32.mrf.mxu1  ;;  %v2558_v37 = vpop.f32.mrf.mxu0 }
 0x8b1   :  { %2647 = vpow2.f32 %v2409_v54 }
 0x8ba   :  { %v2646_v46 = vpop.eup %2645 }
 0x8bb   :  { %v2261_v48 = vadd.f32 1.0, %v2646_v46 }
 0x8bd   :  { %2649 = vrcp.f32 %v2261_v48 }
 0x8be   :  { %v2648_v49 = vpop.eup %2647 }
 0x8bf   :  { %v2262_v52 = vadd.f32 1.0, %v2648_v49 }
 0x8c1   :  { %2651 = vrcp.f32 %v2262_v52 }
 0x8ca   :  { %v2650_v7 = vpop.eup %2649 }
 0x8cb   :  { %v2267_v56 = vmul.f32 %v2650_v7, %v2191_v36 }
 0x8cd   :  { %v2269_v41 = vmul.f32 %v2267_v56, %v2248_v19 }
 0x8ce   :  { %v2652_v57 = vpop.eup %2651 }
 0x8cf   :  { %v2268_v59 = vmul.f32 %v2652_v57, %v2194_v40 }
 0x8d1   :  { %v2270_v60 = vmul.f32 %v2268_v59, %v2251_v42 }
 0x8d3   :  { %v2271_v61 = vpack.c.bf16 %v2270_v60, %v2269_v41 }
 0x8d5   :  { %2568 = vmatmul.mubr.msk.bf16.vlgmr.msra.gmra.mxu1 %vm2304_vm2, %v2271_v61 }
 0x995   :  { %v2342_v63 = vpop.f32.mrf.mxu1 }
 0x996   :  { %v2349_v0 = vadd.f32 %v2342_v63, %v3308_v47 }
 0x997   :  { %v2569_v55 = vpop.f32.mrf.mxu1 }
 0x998   :  { %2351 = vst.msk [vmem:[#allocation3] sm:$0xff] %vm43_vm0, %v2349_v0 }
 0x999   :  { %v2345_v2 = vpop.f32.mrf.mxu1 }
 0x99a   :  { %v2350_v3 = vadd.f32 %v2345_v2, %v3315_v62 }
 0x99b   :  { %v2570_v4 = vpop.f32.mrf.mxu1 }
 0x99c   :  { %2352 = vst.msk [vmem:[#allocation3 + $0x8] sm:$0xff] %vm43_vm0, %v2350_v3 }
 0x99d   :  { %2666 = shalt.err (!%p2663_p4)
}
 0x99e   :  { %s2691_s6 = smov 128  }
 0x99f   :  { %2364 = dma.vmem_to_hbm [thread:$0]  %s2359_s18, 256, %s3392_s10, [#allocation4], %s2691_s6, %s2691_s6, %s2687_s4  }
 0x9a0   :  { %2675 = dma.done.wait [#allocation4], 256  }
 0x9a1   :  { %2676 = vsyncadd [#allocation4], 4294967040 }
 0x9a2   :  { %2372 = vsyncpa [#allocation4], 1 }

</bundles_post_ra>
